<compile_context>
chip_gen: v5e
topology: v5e:2x2
jax: 0.10.0
libtpu: 0.0.40
codegen_flags: <defaults>
</compile_context>

<pallas_src>
import math

import jax
import jax.numpy as jnp
from jax import lax
from jax.experimental import pallas as pl
from jax.experimental.pallas import tpu as pltpu

# ----------------------------- configuration --------------------------------
B, S, T = 2, 8, 8          # batch, decoder seq len, encoder seq len
H = 32                     # hidden size
NH, DH = 4, 8              # num attention heads, head dim (NH * DH == H)
I = 64                     # intermediate (FFN) size
LN_EPS = 1e-12             # HF BERT LayerNorm eps

M = B * S                  # flattened decoder rows (queries)
MK = B * T                 # flattened encoder rows (keys); == M here (S == T)
assert NH * DH == H and M == MK and (M * H) % 128 == 0

# packed parameter-slab row offsets (shared by pack_params and the kernel)
_R_W0 = 0                          # (H rows)  [W_qkv_self | W_q_cross]
_R_W1 = _R_W0 + H                  # (H rows)  [W_kv_cross | W_o_self | W_o_cross]
_R_W2 = _R_W1 + H                  # (H rows)  [W_ffn_in | unused]
_R_W3 = _R_W2 + H                  # (64 rows) [W_ffn_out | head mask | ones blocks]
_R_VEC = _R_W3 + max(I, NH * MK)   # (5 rows)  biases / LN params
_SLAB_ROWS = ((_R_VEC + 5 + 7) // 8) * 8   # 168


# ----------------------------- math helpers ---------------------------------
def _gelu(x):
    # TODO(synk): HF BERT default is exact erf-GELU; tanh approximation used for
    # Mosaic-safe lowering (matches the in-file reference).
    c = math.sqrt(2.0 / math.pi)
    return 0.5 * x * (1.0 + jnp.tanh(c * (x + 0.044715 * x * x * x)))


# ------------------------------ Pallas kernel --------------------------------
def decoder_layer_kernel(x_ref, enc_ref, bias_ref, p_ref, out_ref):
    x = x_ref[...]                    # (M, H)   decoder hidden states (flattened)
    enc = enc_ref[...]                # (MK, H)  encoder hidden states (flattened)

    bias_s = bias_ref[0:M, :]         # (M, NH*MK) self-attn additive bias
    bias_c = bias_ref[M:2 * M, :]     # (M, NH*MK) cross-attn additive bias

    # ---- static carve-outs of the packed parameter slab ----
    w_qkv_s = p_ref[_R_W0:_R_W0 + H, 0:3 * H]          # (H, 3H) Q pre-scaled
    w_q_c = p_ref[_R_W0:_R_W0 + H, 3 * H:4 * H]        # (H, H)  pre-scaled
    w_kv_c = p_ref[_R_W1:_R_W1 + H, 0:2 * H]           # (H, 2H)
    w_o_s = p_ref[_R_W1:_R_W1 + H, 2 * H:3 * H]        # (H, H)
    w_o_c = p_ref[_R_W1:_R_W1 + H, 3 * H:4 * H]        # (H, H)
    w_ffn_i = p_ref[_R_W2:_R_W2 + H, 0:I]              # (H, I)
    w_ffn_o = p_ref[_R_W3:_R_W3 + I, 0:H]              # (I, H)
    headmsk = p_ref[_R_W3:_R_W3 + NH * MK, H:2 * H]            # (NH*MK, H)
    ones_bk = p_ref[_R_W3:_R_W3 + NH * MK, 2 * H:2 * H + NH * MK]  # (NH*MK, NH*MK)

    vec = p_ref[_R_VEC:_R_VEC + 8, :]                   # (8, 128) packed vectors
    b_qkv_s, b_q_c = vec[0:1, 0:3 * H], vec[0:1, 3 * H:4 * H]
    b_kv_c, b_ffn_i = vec[1:2, 0:2 * H], vec[1:2, 2 * H:2 * H + I]
    b_o_s, b_o_c, b_ffn_o = vec[2:3, 0:H], vec[2:3, H:2 * H], vec[2:3, 2 * H:3 * H]
    g_s, g_c, g_f = vec[3:4, 0:H], vec[3:4, H:2 * H], vec[3:4, 2 * H:3 * H]
    e_s, e_c, e_f = vec[4:5, 0:H], vec[4:5, H:2 * H], vec[4:5, 2 * H:3 * H]

    def layernorm(z, g, b):
        mu = jnp.mean(z, axis=-1, keepdims=True)
        zc = z - mu
        var = jnp.mean(zc * zc, axis=-1, keepdims=True)
        return zc * lax.rsqrt(var + LN_EPS) * g + b

    def mha(q, k, v, bias, w_o, b_o, resid, g, b):
        # q: (M, H) pre-scaled by 1/sqrt(DH); k, v: (MK, H); bias: (M, NH*MK).
        # Heads folded into the key/column axis: row block h of k_exp / v_exp
        # keeps only head-h feature columns, so a single score matmul produces
        # all per-head scores and a single context matmul produces the
        # already-concatenated per-head context (the head sum of the output
        # projection is fused into the final flat matmul).
        k_exp = jnp.concatenate([k] * NH, axis=0) * headmsk      # (NH*MK, H)
        v_exp = jnp.concatenate([v] * NH, axis=0) * headmsk      # (NH*MK, H)
        s = lax.dot_general(q, k_exp, (((1,), (1,)), ((), ())),
                            preferred_element_type=jnp.float32) + bias  # (M, NH*MK)
        s = s - jnp.max(s, axis=-1, keepdims=True)   # any per-row shift is valid
        p = jnp.exp(s)
        # per-head softmax denominators via one matmul with block-ones constant
        denom = jnp.dot(p, ones_bk, preferred_element_type=jnp.float32)
        p = p * pl.reciprocal(denom, approx=True)
        ctx = jnp.dot(p, v_exp, preferred_element_type=jnp.float32)     # (M, H)
        proj = jnp.dot(ctx, w_o, preferred_element_type=jnp.float32) + b_o
        return layernorm(proj + resid, g, b)

    # ---------------- self-attention: fused flat QKV projection -------------
    qkv = jnp.dot(x, w_qkv_s, preferred_element_type=jnp.float32) + b_qkv_s
    attn = mha(qkv[:, 0:H], qkv[:, H:2 * H], qkv[:, 2 * H:3 * H],
               bias_s, w_o_s, b_o_s, x, g_s, e_s)                        # (M, H)

    # ------------- cross-attention: flat Q, fused flat KV from encoder ------
    q_c = jnp.dot(attn, w_q_c, preferred_element_type=jnp.float32) + b_q_c
    kv_c = jnp.dot(enc, w_kv_c, preferred_element_type=jnp.float32) + b_kv_c
    cross = mha(q_c, kv_c[:, 0:H], kv_c[:, H:2 * H],
                bias_c, w_o_c, b_o_c, attn, g_c, e_c)                    # (M, H)

    # --------------------------------- FFN ----------------------------------
    inter = _gelu(jnp.dot(cross, w_ffn_i,
                          preferred_element_type=jnp.float32) + b_ffn_i)  # (M, I)
    ffn = jnp.dot(inter, w_ffn_o, preferred_element_type=jnp.float32) + b_ffn_o
    y = layernorm(ffn + cross, g_f, e_f)                                  # (M, H)

    # ---------------- lane-dense output: (M, H) -> (M*H/128, 128) -----------
    rows = 128 // H
    out_ref[...] = jnp.concatenate(
        [y[c * rows:(c + 1) * rows, :] for c in range(M * H // 128)],
        axis=1).astype(out_ref.dtype)


# ------------------------------- wrapper --------------------------------------
def decoder_layer(hidden_states, encoder_hidden_states, encoder_attention_mask,
                  slab):
    b, s, h = hidden_states.shape
    _, t, _ = encoder_hidden_states.shape
    x_flat = hidden_states.reshape(b * s, h)
    e_flat = encoder_hidden_states.reshape(b * t, h)

    # Host-side additive score biases (batch block structure is static; the
    # encoder padding mask contribution depends on the runtime mask input).
    q_b = jnp.repeat(jnp.arange(b), s)
    kd_b = jnp.repeat(jnp.arange(b), s)
    ke_b = jnp.repeat(jnp.arange(b), t)
    neg = jnp.float32(-1e30)
    self_blk = jnp.where(q_b[:, None] == kd_b[None, :],
                         jnp.float32(0.0), neg)                        # (b*s, b*s)
    mask_add = (1.0 - encoder_attention_mask.reshape(b * t)
                .astype(jnp.float32)) * -10000.0
    cross_blk = jnp.where(q_b[:, None] == ke_b[None, :],
                          jnp.float32(0.0), neg) + mask_add[None, :]   # (b*s, b*t)
    bias = jnp.concatenate([jnp.tile(self_blk, (1, NH)),
                            jnp.tile(cross_blk, (1, NH))], axis=0)     # (2*M, NH*MK)

    vmem = pl.BlockSpec(memory_space=pltpu.MemorySpace.VMEM)
    out_dense = pl.pallas_call(
        decoder_layer_kernel,
        out_shape=jax.ShapeDtypeStruct((b * s * h // 128, 128), jnp.float32),
        in_specs=[vmem, vmem, vmem, vmem],
        out_specs=vmem,
    )(x_flat, e_flat, bias, slab)

    # unpack the lane-dense result back to (b*s, h); contiguous, cheap XLA ops
    y = jnp.concatenate([out_dense[:, c * h:(c + 1) * h]
                         for c in range((b * s * h) // 128)], axis=0)
    return y.reshape(b, s, h)
    # TODO(synk): on v7x, batching several independent layer calls onto a
    # leading "parallel" grid axis would use the second TensorCore.


# ------------------------- parameter init & packing ---------------------------
def _init_attn(key):
    ks = jax.random.split(key, 10)
    w = lambda k, fi, fo: 0.02 * jax.random.normal(k, (fi, fo), jnp.float32)
    v = lambda k, n, sc: sc * jax.random.normal(k, (n,), jnp.float32)
    return dict(q_w=w(ks[0], H, H), q_b=v(ks[1], H, 0.02),
                k_w=w(ks[2], H, H), k_b=v(ks[3], H, 0.02),
                v_w=w(ks[4], H, H), v_b=v(ks[5], H, 0.02),
                o_w=w(ks[6], H, H), o_b=v(ks[7], H, 0.02),
                ln_g=1.0 + v(ks[8], H, 0.1), ln_b=v(ks[9], H, 0.1))


def _init_ffn(key):
    ks = jax.random.split(key, 6)
    w = lambda k, fi, fo: 0.02 * jax.random.normal(k, (fi, fo), jnp.float32)
    v = lambda k, n, sc: sc * jax.random.normal(k, (n,), jnp.float32)
    return dict(i_w=w(ks[0], H, I), i_b=v(ks[1], I, 0.02),
                o_w=w(ks[2], I, H), o_b=v(ks[3], H, 0.02),
                ln_g=1.0 + v(ks[4], H, 0.1), ln_b=v(ks[5], H, 0.1))


def init_params(key):
    k1, k2, k3 = jax.random.split(key, 3)
    return {"self_attn": _init_attn(k1),
            "cross_attn": _init_attn(k2),
            "ffn": _init_ffn(k3)}


def pack_params(params):
    """Host-side packing: all weights, biases, LN params and the two static
    attention constants (per-head column mask, within-head block-ones matrix)
    in ONE lane-dense (168, 128) f32 slab. 1/sqrt(DH) is folded into Q."""
    scale = 1.0 / math.sqrt(DH)
    sa, ca, ff = params["self_attn"], params["cross_attn"], params["ffn"]

    slab = jnp.zeros((_SLAB_ROWS, 128), jnp.float32)
    # weights
    slab = slab.at[_R_W0:_R_W0 + H, 0:3 * H].set(
        jnp.concatenate([sa["q_w"] * scale, sa["k_w"], sa["v_w"]], axis=1))
    slab = slab.at[_R_W0:_R_W0 + H, 3 * H:4 * H].set(ca["q_w"] * scale)
    slab = slab.at[_R_W1:_R_W1 + H, 0:2 * H].set(
        jnp.concatenate([ca["k_w"], ca["v_w"]], axis=1))
    slab = slab.at[_R_W1:_R_W1 + H, 2 * H:3 * H].set(sa["o_w"])
    slab = slab.at[_R_W1:_R_W1 + H, 3 * H:4 * H].set(ca["o_w"])
    slab = slab.at[_R_W2:_R_W2 + H, 0:I].set(ff["i_w"])
    slab = slab.at[_R_W3:_R_W3 + I, 0:H].set(ff["o_w"])
    # static attention constants (B*S == B*T so one copy serves both attns)
    headmask = jnp.kron(jnp.eye(NH, dtype=jnp.float32),
                        jnp.ones((MK, DH), jnp.float32))           # (NH*MK, H)
    ones_blk = jnp.kron(jnp.eye(NH, dtype=jnp.float32),
                        jnp.ones((MK, MK), jnp.float32))           # (NH*MK, NH*MK)
    slab = slab.at[_R_W3:_R_W3 + NH * MK, H:2 * H].set(headmask)
    slab = slab.at[_R_W3:_R_W3 + NH * MK, 2 * H:2 * H + NH * MK].set(ones_blk)
    # packed bias / LN rows
    slab = slab.at[_R_VEC, 0:3 * H].set(
        jnp.concatenate([sa["q_b"] * scale, sa["k_b"], sa["v_b"]]))
    slab = slab.at[_R_VEC, 3 * H:4 * H].set(ca["q_b"] * scale)
    slab = slab.at[_R_VEC + 1, 0:2 * H].set(jnp.concatenate([ca["k_b"], ca["v_b"]]))
    slab = slab.at[_R_VEC + 1, 2 * H:2 * H + I].set(ff["i_b"])
    slab = slab.at[_R_VEC + 2, 0:H].set(sa["o_b"])
    slab = slab.at[_R_VEC + 2, H:2 * H].set(ca["o_b"])
    slab = slab.at[_R_VEC + 2, 2 * H:3 * H].set(ff["o_b"])
    slab = slab.at[_R_VEC + 3, 0:H].set(sa["ln_g"])
    slab = slab.at[_R_VEC + 3, H:2 * H].set(ca["ln_g"])
    slab = slab.at[_R_VEC + 3, 2 * H:3 * H].set(ff["ln_g"])
    slab = slab.at[_R_VEC + 4, 0:H].set(sa["ln_b"])
    slab = slab.at[_R_VEC + 4, H:2 * H].set(ca["ln_b"])
    slab = slab.at[_R_VEC + 4, 2 * H:3 * H].set(ff["ln_b"])
    return slab


# ----------------------------- pure-JAX reference -----------------------------
def ref_decoder_layer(hs, enc, mask, params):
    def layernorm(x, g, b):
        mu = x.mean(-1, keepdims=True)
        var = ((x - mu) ** 2).mean(-1, keepdims=True)
        return (x - mu) / jnp.sqrt(var + LN_EPS) * g + b

    def attention(x, kv, p, bias):
        q = x @ p["q_w"] + p["q_b"]
        k = kv @ p["k_w"] + p["k_b"]
        v = kv @ p["v_w"] + p["v_b"]
        ctx = []
        for h in range(NH):
            sl = slice(h * DH, (h + 1) * DH)
            s = (q[:, sl] @ k[:, sl].T) / math.sqrt(DH)
            if bias is not None:
                s = s + bias
            probs = jax.nn.softmax(s, axis=-1)
            ctx.append(probs @ v[:, sl])
        ctx = jnp.concatenate(ctx, axis=-1)
        proj = ctx @ p["o_w"] + p["o_b"]
        return layernorm(proj + x, p["ln_g"], p["ln_b"])

    outs = []
    for bi in range(hs.shape[0]):
        x, e = hs[bi], enc[bi]
        bias = (1.0 - mask[bi][None, :]) * -10000.0
        a = attention(x, x, params["self_attn"], None)
        c = attention(a, e, params["cross_attn"], bias)
        ff = params["ffn"]
        inter = _gelu(c @ ff["i_w"] + ff["i_b"])
        proj = inter @ ff["o_w"] + ff["o_b"]
        outs.append(layernorm(proj + c, ff["ln_g"], ff["ln_b"]))
    return jnp.stack(outs)


# ---------------------------------- main ---------------------------------------
if __name__ == "__main__":
    key = jax.random.PRNGKey(0)
    k_hs, k_enc, k_mask, k_params = jax.random.split(key, 4)

    hidden_states = jax.random.normal(k_hs, (B, S, H), jnp.float32)
    encoder_hidden_states = jax.random.normal(k_enc, (B, T, H), jnp.float32)
    # 2-D padding mask (1 = attend, 0 = masked), i.e. the dim==2 branch
    encoder_attention_mask = (
        jax.random.uniform(k_mask, (B, T)) > 0.25).astype(jnp.float32)

    params = init_params(k_params)
    slab = pack_params(params)

    out = decoder_layer(hidden_states, encoder_hidden_states,
                        encoder_attention_mask, slab)
    out = jax.block_until_ready(out)

    ref = ref_decoder_layer(hidden_states, encoder_hidden_states,
                            encoder_attention_mask, params)
    assert out.shape == (B, S, H)
    max_err = float(jnp.max(jnp.abs(out - ref)))
    # tolerance covers the EUP approx-reciprocal in the kernel's softmax
    assert jnp.allclose(out, ref, atol=2e-3, rtol=2e-3), (
        f"mismatch vs reference (max abs err {max_err})")

    print("KERNEL_OK")
</pallas_src>

<mosaic_0001>
module attributes {stable_mosaic.version = 11 : i64} {
  func.func @decoder_layer_kernel(%arg0: memref<16x32xf32, #tpu.memory_space<vmem>>, %arg1: memref<16x32xf32, #tpu.memory_space<vmem>>, %arg2: memref<32x64xf32, #tpu.memory_space<vmem>>, %arg3: memref<168x128xf32, #tpu.memory_space<vmem>>, %arg4: memref<4x128xf32, #tpu.memory_space<vmem>>) attributes {dimension_semantics = [], scalar_prefetch = 0 : i64, scratch_operands = 0 : i64, tpu.core_type = #tpu.core_type<tc>} {
    %c0 = arith.constant 0 : index
    %c0_0 = arith.constant 0 : index
    %0 = vector.load %arg0[%c0, %c0_0] : memref<16x32xf32, #tpu.memory_space<vmem>>, vector<16x32xf32>
    %c0_1 = arith.constant 0 : index
    %c0_2 = arith.constant 0 : index
    %1 = vector.load %arg1[%c0_1, %c0_2] : memref<16x32xf32, #tpu.memory_space<vmem>>, vector<16x32xf32>
    %c0_3 = arith.constant 0 : index
    %c0_4 = arith.constant 0 : index
    %2 = vector.load %arg2[%c0_3, %c0_4] : memref<32x64xf32, #tpu.memory_space<vmem>>, vector<16x64xf32>
    %c16 = arith.constant 16 : index
    %c0_5 = arith.constant 0 : index
    %3 = vector.load %arg2[%c16, %c0_5] : memref<32x64xf32, #tpu.memory_space<vmem>>, vector<16x64xf32>
    %c0_6 = arith.constant 0 : index
    %c0_7 = arith.constant 0 : index
    %4 = vector.load %arg3[%c0_6, %c0_7] : memref<168x128xf32, #tpu.memory_space<vmem>>, vector<32x96xf32>
    %c0_8 = arith.constant 0 : index
    %c96 = arith.constant 96 : index
    %5 = vector.load %arg3[%c0_8, %c96] : memref<168x128xf32, #tpu.memory_space<vmem>>, vector<32x32xf32>
    %c32 = arith.constant 32 : index
    %c0_9 = arith.constant 0 : index
    %6 = vector.load %arg3[%c32, %c0_9] : memref<168x128xf32, #tpu.memory_space<vmem>>, vector<32x64xf32>
    %c32_10 = arith.constant 32 : index
    %c64 = arith.constant 64 : index
    %7 = vector.load %arg3[%c32_10, %c64] : memref<168x128xf32, #tpu.memory_space<vmem>>, vector<32x32xf32>
    %c32_11 = arith.constant 32 : index
    %c96_12 = arith.constant 96 : index
    %8 = vector.load %arg3[%c32_11, %c96_12] : memref<168x128xf32, #tpu.memory_space<vmem>>, vector<32x32xf32>
    %c64_13 = arith.constant 64 : index
    %c0_14 = arith.constant 0 : index
    %9 = vector.load %arg3[%c64_13, %c0_14] : memref<168x128xf32, #tpu.memory_space<vmem>>, vector<32x64xf32>
    %c96_15 = arith.constant 96 : index
    %c0_16 = arith.constant 0 : index
    %10 = vector.load %arg3[%c96_15, %c0_16] : memref<168x128xf32, #tpu.memory_space<vmem>>, vector<64x32xf32>
    %c96_17 = arith.constant 96 : index
    %c32_18 = arith.constant 32 : index
    %11 = vector.load %arg3[%c96_17, %c32_18] : memref<168x128xf32, #tpu.memory_space<vmem>>, vector<64x32xf32>
    %c96_19 = arith.constant 96 : index
    %c64_20 = arith.constant 64 : index
    %12 = vector.load %arg3[%c96_19, %c64_20] : memref<168x128xf32, #tpu.memory_space<vmem>>, vector<64x64xf32>
    %c160 = arith.constant 160 : index
    %c0_21 = arith.constant 0 : index
    %13 = vector.load %arg3[%c160, %c0_21] : memref<168x128xf32, #tpu.memory_space<vmem>>, vector<8x128xf32>
    %14 = vector.extract_strided_slice %13 {offsets = [0, 0], sizes = [1, 96], strides = [1, 1]} : vector<8x128xf32> to vector<1x96xf32>
    %15 = vector.extract_strided_slice %13 {offsets = [0, 96], sizes = [1, 32], strides = [1, 1]} : vector<8x128xf32> to vector<1x32xf32>
    %16 = vector.extract_strided_slice %13 {offsets = [1, 0], sizes = [1, 64], strides = [1, 1]} : vector<8x128xf32> to vector<1x64xf32>
    %17 = vector.extract_strided_slice %13 {offsets = [1, 64], sizes = [1, 64], strides = [1, 1]} : vector<8x128xf32> to vector<1x64xf32>
    %18 = vector.extract_strided_slice %13 {offsets = [2, 0], sizes = [1, 32], strides = [1, 1]} : vector<8x128xf32> to vector<1x32xf32>
    %19 = vector.extract_strided_slice %13 {offsets = [2, 32], sizes = [1, 32], strides = [1, 1]} : vector<8x128xf32> to vector<1x32xf32>
    %20 = vector.extract_strided_slice %13 {offsets = [2, 64], sizes = [1, 32], strides = [1, 1]} : vector<8x128xf32> to vector<1x32xf32>
    %21 = vector.extract_strided_slice %13 {offsets = [3, 0], sizes = [1, 32], strides = [1, 1]} : vector<8x128xf32> to vector<1x32xf32>
    %22 = vector.extract_strided_slice %13 {offsets = [3, 32], sizes = [1, 32], strides = [1, 1]} : vector<8x128xf32> to vector<1x32xf32>
    %23 = vector.extract_strided_slice %13 {offsets = [3, 64], sizes = [1, 32], strides = [1, 1]} : vector<8x128xf32> to vector<1x32xf32>
    %24 = vector.extract_strided_slice %13 {offsets = [4, 0], sizes = [1, 32], strides = [1, 1]} : vector<8x128xf32> to vector<1x32xf32>
    %25 = vector.extract_strided_slice %13 {offsets = [4, 32], sizes = [1, 32], strides = [1, 1]} : vector<8x128xf32> to vector<1x32xf32>
    %26 = vector.extract_strided_slice %13 {offsets = [4, 64], sizes = [1, 32], strides = [1, 1]} : vector<8x128xf32> to vector<1x32xf32>
    %cst = arith.constant dense<0.000000e+00> : vector<16x96xf32>
    %27 = tpu.matmul %0, %4, %cst {dimension_numbers = #tpu.dot_dimension_numbers<[1], [0], [0], [1], [0, 0, 1, 1], [], []>} : vector<16x32xf32>, vector<32x96xf32>, vector<16x96xf32> -> vector<16x96xf32>
    %28 = vector.broadcast %14 : vector<1x96xf32> to vector<16x96xf32>
    %29 = arith.addf %27, %28 : vector<16x96xf32>
    %30 = vector.extract_strided_slice %29 {offsets = [0, 0], sizes = [16, 32], strides = [1, 1]} : vector<16x96xf32> to vector<16x32xf32>
    %31 = vector.extract_strided_slice %29 {offsets = [0, 32], sizes = [16, 32], strides = [1, 1]} : vector<16x96xf32> to vector<16x32xf32>
    %32 = vector.extract_strided_slice %29 {offsets = [0, 64], sizes = [16, 32], strides = [1, 1]} : vector<16x96xf32> to vector<16x32xf32>
    %33 = tpu.concatenate %31, %31, %31, %31 in 0 : vector<16x32xf32>, vector<16x32xf32>, vector<16x32xf32>, vector<16x32xf32> -> vector<64x32xf32>
    %34 = arith.mulf %33, %11 : vector<64x32xf32>
    %35 = tpu.concatenate %32, %32, %32, %32 in 0 : vector<16x32xf32>, vector<16x32xf32>, vector<16x32xf32>, vector<16x32xf32> -> vector<64x32xf32>
    %36 = arith.mulf %35, %11 : vector<64x32xf32>
    %cst_22 = arith.constant dense<0.000000e+00> : vector<16x64xf32>
    %37 = tpu.matmul %30, %34, %cst_22 {dimension_numbers = #tpu.dot_dimension_numbers<[1], [1], [0], [0], [0, 0, 1, 0], [], []>} : vector<16x32xf32>, vector<64x32xf32>, vector<16x64xf32> -> vector<16x64xf32>
    %38 = arith.addf %37, %2 : vector<16x64xf32>
    %cst_23 = arith.constant dense<0xFF800000> : vector<16xf32>
    %39 = vector.multi_reduction <maximumf>, %38, %cst_23 [1] : vector<16x64xf32> to vector<16xf32>
    %40 = vector.shape_cast %39 : vector<16xf32> to vector<16x1xf32>
    %41 = vector.broadcast %40 : vector<16x1xf32> to vector<16x64xf32>
    %42 = arith.subf %38, %41 : vector<16x64xf32>
    %43 = math.exp %42 : vector<16x64xf32>
    %cst_24 = arith.constant dense<0.000000e+00> : vector<16x64xf32>
    %44 = tpu.matmul %43, %12, %cst_24 {dimension_numbers = #tpu.dot_dimension_numbers<[1], [0], [0], [1], [0, 0, 1, 1], [], []>} : vector<16x64xf32>, vector<64x64xf32>, vector<16x64xf32> -> vector<16x64xf32>
    %45 = tpu.reciprocal %44 {approx = true} : vector<16x64xf32> -> vector<16x64xf32>
    %46 = arith.mulf %43, %45 : vector<16x64xf32>
    %cst_25 = arith.constant dense<0.000000e+00> : vector<16x32xf32>
    %47 = tpu.matmul %46, %36, %cst_25 {dimension_numbers = #tpu.dot_dimension_numbers<[1], [0], [0], [1], [0, 0, 1, 1], [], []>} : vector<16x64xf32>, vector<64x32xf32>, vector<16x32xf32> -> vector<16x32xf32>
    %cst_26 = arith.constant dense<0.000000e+00> : vector<16x32xf32>
    %48 = tpu.matmul %47, %7, %cst_26 {dimension_numbers = #tpu.dot_dimension_numbers<[1], [0], [0], [1], [0, 0, 1, 1], [], []>} : vector<16x32xf32>, vector<32x32xf32>, vector<16x32xf32> -> vector<16x32xf32>
    %49 = vector.broadcast %18 : vector<1x32xf32> to vector<16x32xf32>
    %50 = arith.addf %48, %49 : vector<16x32xf32>
    %51 = arith.addf %50, %0 : vector<16x32xf32>
    %cst_27 = arith.constant dense<0.000000e+00> : vector<16xf32>
    %52 = vector.multi_reduction <add>, %51, %cst_27 [1] : vector<16x32xf32> to vector<16xf32>
    %53 = vector.shape_cast %52 : vector<16xf32> to vector<16x1xf32>
    %cst_28 = arith.constant 3.200000e+01 : f32
    %54 = vector.broadcast %cst_28 : f32 to vector<16x1xf32>
    %55 = arith.divf %53, %54 : vector<16x1xf32>
    %56 = vector.broadcast %55 : vector<16x1xf32> to vector<16x32xf32>
    %57 = arith.subf %51, %56 : vector<16x32xf32>
    %58 = arith.mulf %57, %57 : vector<16x32xf32>
    %cst_29 = arith.constant dense<0.000000e+00> : vector<16xf32>
    %59 = vector.multi_reduction <add>, %58, %cst_29 [1] : vector<16x32xf32> to vector<16xf32>
    %60 = vector.shape_cast %59 : vector<16xf32> to vector<16x1xf32>
    %cst_30 = arith.constant 3.200000e+01 : f32
    %61 = vector.broadcast %cst_30 : f32 to vector<16x1xf32>
    %62 = arith.divf %60, %61 : vector<16x1xf32>
    %cst_31 = arith.constant 9.99999996E-13 : f32
    %63 = vector.broadcast %cst_31 : f32 to vector<16x1xf32>
    %64 = arith.addf %62, %63 : vector<16x1xf32>
    %65 = math.rsqrt %64 : vector<16x1xf32>
    %66 = vector.broadcast %65 : vector<16x1xf32> to vector<16x32xf32>
    %67 = arith.mulf %57, %66 : vector<16x32xf32>
    %68 = vector.broadcast %21 : vector<1x32xf32> to vector<16x32xf32>
    %69 = arith.mulf %67, %68 : vector<16x32xf32>
    %70 = vector.broadcast %24 : vector<1x32xf32> to vector<16x32xf32>
    %71 = arith.addf %69, %70 : vector<16x32xf32>
    %cst_32 = arith.constant dense<0.000000e+00> : vector<16x32xf32>
    %72 = tpu.matmul %71, %5, %cst_32 {dimension_numbers = #tpu.dot_dimension_numbers<[1], [0], [0], [1], [0, 0, 1, 1], [], []>} : vector<16x32xf32>, vector<32x32xf32>, vector<16x32xf32> -> vector<16x32xf32>
    %73 = vector.broadcast %15 : vector<1x32xf32> to vector<16x32xf32>
    %74 = arith.addf %72, %73 : vector<16x32xf32>
    %cst_33 = arith.constant dense<0.000000e+00> : vector<16x64xf32>
    %75 = tpu.matmul %1, %6, %cst_33 {dimension_numbers = #tpu.dot_dimension_numbers<[1], [0], [0], [1], [0, 0, 1, 1], [], []>} : vector<16x32xf32>, vector<32x64xf32>, vector<16x64xf32> -> vector<16x64xf32>
    %76 = vector.broadcast %16 : vector<1x64xf32> to vector<16x64xf32>
    %77 = arith.addf %75, %76 : vector<16x64xf32>
    %78 = vector.extract_strided_slice %77 {offsets = [0, 0], sizes = [16, 32], strides = [1, 1]} : vector<16x64xf32> to vector<16x32xf32>
    %79 = vector.extract_strided_slice %77 {offsets = [0, 32], sizes = [16, 32], strides = [1, 1]} : vector<16x64xf32> to vector<16x32xf32>
    %80 = tpu.concatenate %78, %78, %78, %78 in 0 : vector<16x32xf32>, vector<16x32xf32>, vector<16x32xf32>, vector<16x32xf32> -> vector<64x32xf32>
    %81 = arith.mulf %80, %11 : vector<64x32xf32>
    %82 = tpu.concatenate %79, %79, %79, %79 in 0 : vector<16x32xf32>, vector<16x32xf32>, vector<16x32xf32>, vector<16x32xf32> -> vector<64x32xf32>
    %83 = arith.mulf %82, %11 : vector<64x32xf32>
    %cst_34 = arith.constant dense<0.000000e+00> : vector<16x64xf32>
    %84 = tpu.matmul %74, %81, %cst_34 {dimension_numbers = #tpu.dot_dimension_numbers<[1], [1], [0], [0], [0, 0, 1, 0], [], []>} : vector<16x32xf32>, vector<64x32xf32>, vector<16x64xf32> -> vector<16x64xf32>
    %85 = arith.addf %84, %3 : vector<16x64xf32>
    %cst_35 = arith.constant dense<0xFF800000> : vector<16xf32>
    %86 = vector.multi_reduction <maximumf>, %85, %cst_35 [1] : vector<16x64xf32> to vector<16xf32>
    %87 = vector.shape_cast %86 : vector<16xf32> to vector<16x1xf32>
    %88 = vector.broadcast %87 : vector<16x1xf32> to vector<16x64xf32>
    %89 = arith.subf %85, %88 : vector<16x64xf32>
    %90 = math.exp %89 : vector<16x64xf32>
    %cst_36 = arith.constant dense<0.000000e+00> : vector<16x64xf32>
    %91 = tpu.matmul %90, %12, %cst_36 {dimension_numbers = #tpu.dot_dimension_numbers<[1], [0], [0], [1], [0, 0, 1, 1], [], []>} : vector<16x64xf32>, vector<64x64xf32>, vector<16x64xf32> -> vector<16x64xf32>
    %92 = tpu.reciprocal %91 {approx = true} : vector<16x64xf32> -> vector<16x64xf32>
    %93 = arith.mulf %90, %92 : vector<16x64xf32>
    %cst_37 = arith.constant dense<0.000000e+00> : vector<16x32xf32>
    %94 = tpu.matmul %93, %83, %cst_37 {dimension_numbers = #tpu.dot_dimension_numbers<[1], [0], [0], [1], [0, 0, 1, 1], [], []>} : vector<16x64xf32>, vector<64x32xf32>, vector<16x32xf32> -> vector<16x32xf32>
    %cst_38 = arith.constant dense<0.000000e+00> : vector<16x32xf32>
    %95 = tpu.matmul %94, %8, %cst_38 {dimension_numbers = #tpu.dot_dimension_numbers<[1], [0], [0], [1], [0, 0, 1, 1], [], []>} : vector<16x32xf32>, vector<32x32xf32>, vector<16x32xf32> -> vector<16x32xf32>
    %96 = vector.broadcast %19 : vector<1x32xf32> to vector<16x32xf32>
    %97 = arith.addf %95, %96 : vector<16x32xf32>
    %98 = arith.addf %97, %71 : vector<16x32xf32>
    %cst_39 = arith.constant dense<0.000000e+00> : vector<16xf32>
    %99 = vector.multi_reduction <add>, %98, %cst_39 [1] : vector<16x32xf32> to vector<16xf32>
    %100 = vector.shape_cast %99 : vector<16xf32> to vector<16x1xf32>
    %cst_40 = arith.constant 3.200000e+01 : f32
    %101 = vector.broadcast %cst_40 : f32 to vector<16x1xf32>
    %102 = arith.divf %100, %101 : vector<16x1xf32>
    %103 = vector.broadcast %102 : vector<16x1xf32> to vector<16x32xf32>
    %104 = arith.subf %98, %103 : vector<16x32xf32>
    %105 = arith.mulf %104, %104 : vector<16x32xf32>
    %cst_41 = arith.constant dense<0.000000e+00> : vector<16xf32>
    %106 = vector.multi_reduction <add>, %105, %cst_41 [1] : vector<16x32xf32> to vector<16xf32>
    %107 = vector.shape_cast %106 : vector<16xf32> to vector<16x1xf32>
    %cst_42 = arith.constant 3.200000e+01 : f32
    %108 = vector.broadcast %cst_42 : f32 to vector<16x1xf32>
    %109 = arith.divf %107, %108 : vector<16x1xf32>
    %cst_43 = arith.constant 9.99999996E-13 : f32
    %110 = vector.broadcast %cst_43 : f32 to vector<16x1xf32>
    %111 = arith.addf %109, %110 : vector<16x1xf32>
    %112 = math.rsqrt %111 : vector<16x1xf32>
    %113 = vector.broadcast %112 : vector<16x1xf32> to vector<16x32xf32>
    %114 = arith.mulf %104, %113 : vector<16x32xf32>
    %115 = vector.broadcast %22 : vector<1x32xf32> to vector<16x32xf32>
    %116 = arith.mulf %114, %115 : vector<16x32xf32>
    %117 = vector.broadcast %25 : vector<1x32xf32> to vector<16x32xf32>
    %118 = arith.addf %116, %117 : vector<16x32xf32>
    %cst_44 = arith.constant dense<0.000000e+00> : vector<16x64xf32>
    %119 = tpu.matmul %118, %9, %cst_44 {dimension_numbers = #tpu.dot_dimension_numbers<[1], [0], [0], [1], [0, 0, 1, 1], [], []>} : vector<16x32xf32>, vector<32x64xf32>, vector<16x64xf32> -> vector<16x64xf32>
    %120 = vector.broadcast %17 : vector<1x64xf32> to vector<16x64xf32>
    %121 = arith.addf %119, %120 : vector<16x64xf32>
    %cst_45 = arith.constant 5.000000e-01 : f32
    %122 = vector.broadcast %cst_45 : f32 to vector<16x64xf32>
    %123 = arith.mulf %122, %121 : vector<16x64xf32>
    %cst_46 = arith.constant 4.471500e-02 : f32
    %124 = vector.broadcast %cst_46 : f32 to vector<16x64xf32>
    %125 = arith.mulf %124, %121 : vector<16x64xf32>
    %126 = arith.mulf %125, %121 : vector<16x64xf32>
    %127 = arith.mulf %126, %121 : vector<16x64xf32>
    %128 = arith.addf %121, %127 : vector<16x64xf32>
    %cst_47 = arith.constant 0.797884583 : f32
    %129 = vector.broadcast %cst_47 : f32 to vector<16x64xf32>
    %130 = arith.mulf %129, %128 : vector<16x64xf32>
    %131 = math.tanh %130 : vector<16x64xf32>
    %cst_48 = arith.constant 1.000000e+00 : f32
    %132 = vector.broadcast %cst_48 : f32 to vector<16x64xf32>
    %133 = arith.addf %132, %131 : vector<16x64xf32>
    %134 = arith.mulf %123, %133 : vector<16x64xf32>
    %cst_49 = arith.constant dense<0.000000e+00> : vector<16x32xf32>
    %135 = tpu.matmul %134, %10, %cst_49 {dimension_numbers = #tpu.dot_dimension_numbers<[1], [0], [0], [1], [0, 0, 1, 1], [], []>} : vector<16x64xf32>, vector<64x32xf32>, vector<16x32xf32> -> vector<16x32xf32>
    %136 = vector.broadcast %20 : vector<1x32xf32> to vector<16x32xf32>
    %137 = arith.addf %135, %136 : vector<16x32xf32>
    %138 = arith.addf %137, %118 : vector<16x32xf32>
    %cst_50 = arith.constant dense<0.000000e+00> : vector<16xf32>
    %139 = vector.multi_reduction <add>, %138, %cst_50 [1] : vector<16x32xf32> to vector<16xf32>
    %140 = vector.shape_cast %139 : vector<16xf32> to vector<16x1xf32>
    %cst_51 = arith.constant 3.200000e+01 : f32
    %141 = vector.broadcast %cst_51 : f32 to vector<16x1xf32>
    %142 = arith.divf %140, %141 : vector<16x1xf32>
    %143 = vector.broadcast %142 : vector<16x1xf32> to vector<16x32xf32>
    %144 = arith.subf %138, %143 : vector<16x32xf32>
    %145 = arith.mulf %144, %144 : vector<16x32xf32>
    %cst_52 = arith.constant dense<0.000000e+00> : vector<16xf32>
    %146 = vector.multi_reduction <add>, %145, %cst_52 [1] : vector<16x32xf32> to vector<16xf32>
    %147 = vector.shape_cast %146 : vector<16xf32> to vector<16x1xf32>
    %cst_53 = arith.constant 3.200000e+01 : f32
    %148 = vector.broadcast %cst_53 : f32 to vector<16x1xf32>
    %149 = arith.divf %147, %148 : vector<16x1xf32>
    %cst_54 = arith.constant 9.99999996E-13 : f32
    %150 = vector.broadcast %cst_54 : f32 to vector<16x1xf32>
    %151 = arith.addf %149, %150 : vector<16x1xf32>
    %152 = math.rsqrt %151 : vector<16x1xf32>
    %153 = vector.broadcast %152 : vector<16x1xf32> to vector<16x32xf32>
    %154 = arith.mulf %144, %153 : vector<16x32xf32>
    %155 = vector.broadcast %23 : vector<1x32xf32> to vector<16x32xf32>
    %156 = arith.mulf %154, %155 : vector<16x32xf32>
    %157 = vector.broadcast %26 : vector<1x32xf32> to vector<16x32xf32>
    %158 = arith.addf %156, %157 : vector<16x32xf32>
    %159 = vector.extract_strided_slice %158 {offsets = [0, 0], sizes = [4, 32], strides = [1, 1]} : vector<16x32xf32> to vector<4x32xf32>
    %160 = vector.extract_strided_slice %158 {offsets = [4, 0], sizes = [4, 32], strides = [1, 1]} : vector<16x32xf32> to vector<4x32xf32>
    %161 = vector.extract_strided_slice %158 {offsets = [8, 0], sizes = [4, 32], strides = [1, 1]} : vector<16x32xf32> to vector<4x32xf32>
    %162 = vector.extract_strided_slice %158 {offsets = [12, 0], sizes = [4, 32], strides = [1, 1]} : vector<16x32xf32> to vector<4x32xf32>
    %163 = tpu.concatenate %159, %160, %161, %162 in 1 : vector<4x32xf32>, vector<4x32xf32>, vector<4x32xf32>, vector<4x32xf32> -> vector<4x128xf32>
    %c0_55 = arith.constant 0 : index
    %c0_56 = arith.constant 0 : index
    %164 = vector.load %arg4[%c0_55, %c0_56] : memref<4x128xf32, #tpu.memory_space<vmem>>, vector<4x128xf32>
    tpu.vector_store %arg4[%c0_55, %c0_56], %163 {strides = array<i32>} : memref<4x128xf32, #tpu.memory_space<vmem>>, vector<4x128xf32>,
    return
  }
}

</mosaic_0001>

<bundles_post_ra>
// kernel: tpu_custom_call.1
= control target key start
LH: loop header
LB: loop body
LE: loop exit
PB: predicated region body
PF: predicated region fallthrough
CT: control target
= control target key end

     0   :  { %9 = vsyncpa [#allocation3], 0  ;;  %s1779_s0 = inlined_call_operand.hbm [shape: f32[16,32], index: 0, kind: input, shape index: {}]   ;;  %s1780_s1 = inlined_call_operand.hbm [shape: f32[16,32], index: 1, kind: input, shape index: {}]   ;;  %s1781_s2 = inlined_call_operand.hbm [shape: f32[32,64], index: 2, kind: input, shape index: {}]   ;;  %s1782_s3 = inlined_call_operand.hbm [shape: f32[168,128], index: 3, kind: input, shape index: {}]   ;;  %s1783_s4 = inlined_call_operand.hbm [shape: f32[4,128], index: 4, kind: output, shape index: {}]  }
   0x1   :  { %10 = vsyncpa [#allocation6], 0 }
   0x2   :  { %11 = vsyncpa [#allocation9], 0 }
   0x3   :  { %12 = vsyncpa [#allocation4], 0  ;;  %s30_s17 = sshll.u32 %s1780_s1, 4  ;;  %s1364_s18 = smov [#allocation5]   ;;  %s31_s17 = int_to_ptr.hbm [resolvable:$true] %s30_s17 }
   0x4   :  { %s32_s19 = sshll.u32 %s1364_s18, 4  ;;  %s17_s22 = sshll.u32 %s1779_s0, 4  ;;  %s33_s19 = int_to_ptr.vmem [resolvable:$true] %s32_s19  ;;  %s18_s22 = int_to_ptr.hbm [resolvable:$true] %s17_s22 }
   0x5   :  { %s1365_s23 = smov 128   ;;  %s1366_s24 = smov 8  }
   0x6   :  { %38 = dma.hbm_to_vmem [thread:$0]  %s31_s17, 256, %s33_s19, [#allocation6], %s1365_s23, %s1365_s23, %s1366_s24  }
   0x7   :  { %s1367_s25 = smov [#allocation2]   ;;  %s43_s29 = sshll.u32 %s1781_s2, 4  ;;  %s44_s29 = int_to_ptr.hbm [resolvable:$true] %s43_s29 }
   0x8   :  { %s19_s26 = sshll.u32 %s1367_s25, 4  ;;  %s56_s5 = sshll.u32 %s1782_s3, 4  ;;  %s20_s26 = int_to_ptr.vmem [resolvable:$true] %s19_s26  ;;  %s57_s5 = int_to_ptr.hbm [resolvable:$true] %s56_s5 }
   0x9   :  { %25 = dma.hbm_to_vmem [thread:$0]  %s18_s22, 256, %s20_s26, [#allocation3], %s1365_s23, %s1365_s23, %s1366_s24  }
   0xa   :  { %s1368_s6 = smov [#allocation7]   ;;  %s1369_s0 = smov [#allocation8]  }
   0xb   :  { %s45_s7 = sshll.u32 %s1368_s6, 4  ;;  %s58_s8 = sshll.u32 %s1369_s0, 4  ;;  %s46_s7 = int_to_ptr.vmem [resolvable:$true] %s45_s7  ;;  %s59_s8 = int_to_ptr.vmem [resolvable:$true] %s58_s8 }
   0xc   :  { %51 = dma.hbm_to_vmem [thread:$0]  %s44_s29, 512, %s46_s7, [#allocation6], %s1365_s23, %s1365_s23, %s1366_s24  }
   0xd   :  { %64 = dma.hbm_to_vmem [thread:$0]  %s57_s5, 2688, %s59_s8, [#allocation9], %s1365_s23, %s1365_s23, %s1366_s24  }
   0xe   :  { %1356 = dma.done.wait [#allocation3], 256  }
   0xf   :  { %1357 = vsyncadd [#allocation3], 4294967040 }
  0x10   :  { %1358 = dma.done.wait [#allocation6], 768  }
  0x11   :  { %1359 = vsyncadd [#allocation6], 4294966528 }
  0x12   :  { %1360 = dma.done.wait [#allocation9], 2688  }
  0x13   :  { %1361 = vsyncadd [#allocation9], 4294964608  ;;  %v1412_v0 = vld [vmem:[#allocation8 + $0x18] sm:$0xff]  ;;  %v1414_v1 = vld [vmem:[#allocation8 + $0x10] sm:$0xff]  ;;  %vm111_vm0 = vcmask 261120   ;;  %s1370_s2 = smov 96  }
  0x14   :  { %130 = vmatpush.msra.mxu0 %v1412_v0  ;;  %v1162_v2 = vpack.i.bf16 %v1414_v1, %v1412_v0  ;;  %v1419_v3 = vld [vmem:[#allocation8 + $0x8] sm:$0xff]  ;;  %v1421_v4 = vld [vmem:[#allocation8] sm:$0xff]  ;;  %v1441_v12 = vld [vmem:[#allocation8 + $0x98] sm:$0xff]  ;;  %s1371_s3 = smov 64   ;;  %s1372_s9 = smov 32   ;;  %vm258_vm1 = vcmask 523264  }
  0x15   :  { %v1167_v5 = vpack.i.bf16 %v1421_v4, %v1419_v3  ;;  %v1427_v6 = vld [vmem:[#allocation2] sm:$0xff]  ;;  %v1432_v7 = vld [vmem:[#allocation2 + $0x8] sm:$0xff]  ;;  %v1445_v14 = vld [vmem:[#allocation8 + $0x78] sm:$0xff]  ;;  %s1374_s10 = smov [#allocation10]   ;;  %s1039_s14 = sshll.u32 %s1783_s4, 4  ;;  %s1040_s14 = int_to_ptr.hbm [resolvable:$true] %s1039_s14 }
  0x16   :  { %131 = vmatpush.msra.mxu0 %v1414_v1  ;;  %v1436_v9 = vld [vmem:[#allocation8 + $0xa0] sm:$0xff]  ;;  %v1443_v13 = vld [vmem:[#allocation8 + $0x88] sm:$0xff]  ;;  %v1462_v20 = vld [vmem:[#allocation8 + $0x90] sm:$0xff]  ;;  %s1037_s11 = sshll.u32 %s1374_s10, 4  ;;  %s1038_s11 = int_to_ptr.vmem [resolvable:$true] %s1037_s11 }
  0x17   :  { %v1439_v10 = vperm.slane %v1436_v9, 0  ;;  %v1464_v21 = vld [vmem:[#allocation8 + $0x80] sm:$0xff]  ;;  %v1466_v22 = vld [vmem:[#allocation8 + $0x70] sm:$0xff]  ;;  %v1477_v26 = vld [vmem:[#allocation8 + $0x68] sm:$0xff]  ;;  %v1112_v28 = vpack.i.bf16 %v1462_v20, %v1441_v12 }
  0x18   :  { %132 = vmatpush.msra.mxu0 %v1419_v3  ;;  %v1479_v27 = vld [vmem:[#allocation8 + $0x60] sm:$0xff]  ;;  %v1122_v31 = vpack.i.bf16 %v1466_v22, %v1445_v14  ;;  %v1117_v48 = vpack.i.bf16 %v1464_v21, %v1443_v13  ;;  %v86_v62 = vld [vmem:[#allocation7 + $0x8] sm:$0xff] }
  0x19   :  { %v1127_v32 = vpack.i.bf16 %v1479_v27, %v1477_v26  ;;  %v85_v57 = vld [vmem:[#allocation7] sm:$0xff] }
  0x1a   :  { %133 = vmatpush.msra.mxu0 %v1421_v4 }
  0x1b   :  { %1051 = vmatmul.msk.f32.vlgmr.msra.gmra.mxu0 %vm111_vm0, %v1427_v6 }
  0x23   :  { %1052 = vmatmul.msk.f32.gmra.mxu0 %vm111_vm0, %v1432_v7 }
  0x98   :  { %v135_v8 = vpop.f32.mrf.mxu0 }
  0x99   :  { %v1460_v19 = vadd.f32 %v135_v8, %v1439_v10 }
  0x9b   :  { %v147_v23 = vmul.f32 %v1460_v19, %v1462_v20  ;;  %v145_v24 = vmul.f32 %v1460_v19, %v1464_v21  ;;  %v143_v25 = vmul.f32 %v1460_v19, %v1466_v22  ;;  %v141_v30 = vmul.f32 %v1460_v19, %v1479_v27 }
  0xa0   :  { %v138_v11 = vpop.f32.mrf.mxu0 }
  0xa1   :  { %v1448_v15 = vadd.f32 %v138_v11, %v1439_v10 }
  0xa3   :  { %v148_v16 = vmul.f32 %v1448_v15, %v1441_v12  ;;  %v146_v17 = vmul.f32 %v1448_v15, %v1443_v13  ;;  %v144_v18 = vmul.f32 %v1448_v15, %v1445_v14  ;;  %v142_v29 = vmul.f32 %v1448_v15, %v1477_v26 }
  0xa5   :  { %211 = vrot.lane.b32.xlu0 %v148_v16, %s1370_s2  ;;  %207 = vrot.lane.b32.xlu1 %v146_v17, %s1370_s2 }
  0xa6   :  { %203 = vrot.lane.b32.xlu2 %v144_v18, %s1370_s2 }
  0xad   :  { %209 = vrot.lane.b32.xlu0 %v147_v23, %s1370_s2  ;;  %205 = vrot.lane.b32.xlu1 %v145_v24, %s1370_s2 }
  0xae   :  { %201 = vrot.lane.b32.xlu2 %v143_v25, %s1370_s2 }
  0xb5   :  { %199 = vrot.lane.b32.xlu0 %v142_v29, %s1370_s2  ;;  %197 = vrot.lane.b32.xlu1 %v141_v30, %s1370_s2 }
  0xb6   :  { %1113 = vrot.lane.b32.xlu2 %v1112_v28, %s1371_s3 }
  0xbd   :  { %1118 = vrot.lane.b32.xlu1 %v1117_v48, %s1371_s3 }
  0xbe   :  { %1123 = vrot.lane.b32.xlu2 %v1122_v31, %s1371_s3 }
  0xc6   :  { %1128 = vrot.lane.b32.xlu2 %v1127_v32, %s1371_s3 }
  0xce   :  { %171 = vrot.lane.b32.xlu2 %v1441_v12, %s1372_s9 }
  0xd6   :  { %169 = vrot.lane.b32.xlu2 %v1462_v20, %s1372_s9 }
  0xde   :  { %167 = vrot.lane.b32.xlu2 %v1443_v13, %s1372_s9 }
  0xe6   :  { %165 = vrot.lane.b32.xlu2 %v1464_v21, %s1372_s9 }
  0xee   :  { %161 = vrot.lane.b32.xlu2 %v1466_v22, %s1372_s9 }
  0xf6   :  { %157 = vrot.lane.b32.xlu2 %v1479_v27, %s1372_s9 }
 0x100   :  { %v204_v33 = vpop.permute.xlu2 %203 }
 0x108   :  { %v202_v34 = vpop.permute.xlu2 %201 }
 0x110   :  { %v1114_v35 = vpop.permute.xlu2 %1113 }
 0x111   :  { %v1508_v36 = vunpack.i.h.bf16 %v1114_v35  ;;  %v1510_v37 = vunpack.i.l.bf16 %v1114_v35 }
 0x113   :  { %309 = vmatpush.msra.mxu2 %v1510_v37 }
 0x115   :  { %310 = vmatpush.msra.mxu2 %v1508_v36 }
 0x117   :  { %v212_v38 = vpop.permute.xlu0 %211  ;;  %v208_v40 = vpop.permute.xlu1 %207 }
 0x118   :  { %v1124_v39 = vpop.permute.xlu2 %1123  ;;  %1053 = vmatpush.xpose.msk.msra.mxu1 %vm111_vm0, %v212_v38 }
 0x119   :  { %v1541_v11 = vunpack.i.l.bf16 %v1124_v39  ;;  %v1545_v18 = vunpack.i.h.bf16 %v1124_v39 }
 0x11f   :  { %v210_v41 = vpop.permute.xlu0 %209  ;;  %v206_v43 = vpop.permute.xlu1 %205 }
 0x120   :  { %v1129_v42 = vpop.permute.xlu2 %1128  ;;  %1054 = vmatpush.xpose.msk.msra.mxu1 %vm111_vm0, %v210_v41 }
 0x121   :  { %v1550_v24 = vunpack.i.l.bf16 %v1129_v42  ;;  %v1554_v25 = vunpack.i.h.bf16 %v1129_v42 }
 0x124   :  { %1055 = vmatpush.xpose.msk.msra.mxu1 %vm111_vm0, %v208_v40 }
 0x127   :  { %v200_v49 = vpop.permute.xlu0 %199  ;;  %v198_v51 = vpop.permute.xlu1 %197 }
 0x128   :  { %v172_v44 = vpop.permute.xlu2 %171  ;;  %1056 = vmatpush.xpose.msk.msra.mxu1 %vm111_vm0, %v206_v43 }
 0x129   :  { %v188_v46 = vmul.f32 %v172_v44, %v1448_v15 }
 0x12c   :  { %1057 = vmatpush.xpose.msk.msra.mxu1 %vm111_vm0, %v204_v33 }
 0x12f   :  { %v1119_v61 = vpop.permute.xlu1 %1118 }
 0x130   :  { %v170_v45 = vpop.permute.xlu2 %169  ;;  %1058 = vmatpush.xpose.msk.msra.mxu1 %vm111_vm0, %v202_v34  ;;  %v1537_v63 = vunpack.i.h.bf16 %v1119_v61  ;;  %v1539_v8 = vunpack.i.l.bf16 %v1119_v61 }
 0x131   :  { %v187_v47 = vmul.f32 %v170_v45, %v1460_v19 }
 0x132   :  { %311 = vmatpush.msra.mxu2 %v1539_v8 }
 0x133   :  { %v1132_v50 = vpack.i.bf16 %v187_v47, %v188_v46 }
 0x134   :  { %1059 = vmatpush.xpose.msk.msra.mxu1 %vm111_vm0, %v200_v49  ;;  %312 = vmatpush.msra.mxu2 %v1537_v63 }
 0x136   :  { %313 = vmatpush.msra.mxu2 %v1541_v11 }
 0x138   :  { %v168_v52 = vpop.permute.xlu2 %167  ;;  %1060 = vmatpush.xpose.msk.msra.mxu1 %vm111_vm0, %v198_v51  ;;  %314 = vmatpush.msra.mxu2 %v1545_v18 }
 0x139   :  { %v186_v54 = vmul.f32 %v168_v52, %v1448_v15 }
 0x13a   :  { %315 = vmatpush.msra.mxu2 %v1550_v24 }
 0x13b   :  { %1061 = vmatmul.msk.f32.vlgmr.msra.gmra.mxu1 %vm111_vm0, %v1460_v19 }
 0x13c   :  { %692 = vmatpush.msrb.mxu1 %v1510_v37  ;;  %316 = vmatpush.msra.mxu2 %v1554_v25 }
 0x13e   :  { %693 = vmatpush.msrb.mxu1 %v1508_v36 }
 0x140   :  { %v166_v53 = vpop.permute.xlu2 %165  ;;  %694 = vmatpush.msrb.mxu1 %v1539_v8 }
 0x141   :  { %v185_v55 = vmul.f32 %v166_v53, %v1460_v19 }
 0x142   :  { %695 = vmatpush.msrb.mxu1 %v1537_v63 }
 0x143   :  { %v1137_v56 = vpack.i.bf16 %v185_v55, %v186_v54  ;;  %1062 = vmatmul.msk.f32.gmra.mxu1 %vm111_vm0, %v1448_v15  ;;  %v96_v54 = vld [vmem:[#allocation8 + $0x38] sm:$0xff]  ;;  %v95_v55 = vld [vmem:[#allocation8 + $0x30] sm:$0xff] }
 0x144   :  { %696 = vmatpush.msrb.mxu1 %v1541_v11 }
 0x145   :  { %1138 = vrot.lane.b32.xlu2 %v1137_v56, %s1371_s3  ;;  %v1575_v56 = vpack.i.bf16 %v95_v55, %v96_v54 }
 0x146   :  { %697 = vmatpush.msrb.mxu1 %v1545_v18 }
 0x148   :  { %698 = vmatpush.msrb.mxu1 %v1550_v24  ;;  %v162_v34 = vpop.permute.xlu2 %161 }
 0x149   :  { %v183_v40 = vmul.f32 %v162_v34, %v1460_v19 }
 0x14a   :  { %699 = vmatpush.msrb.mxu1 %v1554_v25 }
 0x150   :  { %v158_v42 = vpop.permute.xlu2 %157 }
 0x19f   :  { %v1139_v46 = vpop.permute.xlu2 %1138 }
 0x1a0   :  { %v1140_v49 = vunpack.i.l.bf16 %v1139_v46  ;;  %v1141_v52 = vunpack.i.h.bf16 %v1139_v46 }
 0x1b8   :  { %v252_v58 = vpop.f32.mrf.mxu1 }
 0x1b9   :  { %v253_v59 = vadd.f32 %v252_v58, %v85_v57  ;;  %v94_v57 = vld [vmem:[#allocation8 + $0x28] sm:$0xff]  ;;  %v93_v58 = vld [vmem:[#allocation8 + $0x20] sm:$0xff] }
 0x1bb   :  { %v259_v60 = vsel %vm258_vm1, %v253_v59, -inf }
 0x1bc   :  { %260 = vmax.xlane.f32.xlu0 %v259_v60 }
 0x1c0   :  { %v255_v16 = vpop.f32.mrf.mxu1 }
 0x1c1   :  { %v256_v17 = vadd.f32 %v255_v16, %v86_v62 }
 0x1c3   :  { %v262_v23 = vsel %vm258_vm1, %v256_v17, -inf }
 0x1c4   :  { %263 = vmax.xlane.f32.xlu1 %v262_v23 }
 0x1d0   :  { %163 = vrot.lane.b32.xlu0 %v1445_v14, %s1372_s9 }
 0x1d8   :  { %1133 = vrot.lane.b32.xlu0 %v1132_v50, %s1371_s3  ;;  %v181_v50 = vmul.f32 %v158_v42, %v1460_v19 }
 0x1dd   :  { %159 = vrot.lane.b32.xlu1 %v1477_v26, %s1372_s9 }
 0x1e5   :  { %1153 = vrot.lane.b32.xlu1 %v1575_v56, %s1371_s3 }
 0x22f   :  { %v261_v28 = vpop.xlane.xlu0 %260 }
 0x230   :  { %v265_v29 = vsub.f32 %v253_v59, %v261_v28  ;;  %v1579_v59 = vpack.i.bf16 %v93_v58, %v94_v57 }
 0x232   :  { %v267_v30 = vmul.f32 1.442695, %v265_v29 }
 0x234   :  { %1202 = vpow2.f32 %v267_v30 }
 0x237   :  { %v264_v31 = vpop.xlane.xlu1 %263 }
 0x238   :  { %v266_v32 = vsub.f32 %v256_v17, %v264_v31 }
 0x23a   :  { %v1203_v33 = vpop.eup %1202  ;;  %v269_v35 = vmul.f32 1.442695, %v266_v32 }
 0x23b   :  { %1063 = vmatmul.msk.f32.vlgmr.msra.gmra.mxu2 %vm258_vm1, %v1203_v33 }
 0x23c   :  { %1204 = vpow2.f32 %v269_v35 }
 0x242   :  { %v1205_v38 = vpop.eup %1204  ;;  %v164_v39 = vpop.permute.xlu0 %163 }
 0x243   :  { %v184_v41 = vmul.f32 %v164_v39, %v1448_v15  ;;  %1064 = vmatmul.msk.f32.gmra.mxu2 %vm258_vm1, %v1205_v38 }
 0x245   :  { %v1142_v43 = vpack.i.bf16 %v183_v40, %v184_v41 }
 0x247   :  { %1143 = vrot.lane.b32.xlu0 %v1142_v43, %s1371_s3 }
 0x24a   :  { %v1134_v44 = vpop.permute.xlu0 %1133 }
 0x24b   :  { %v1135_v45 = vunpack.i.l.bf16 %v1134_v44  ;;  %v1136_v47 = vunpack.i.h.bf16 %v1134_v44 }
 0x24d   :  { %374 = vmatpush.msra.mxu3 %v1135_v45 }
 0x24f   :  { %375 = vmatpush.msra.mxu3 %v1136_v47  ;;  %v160_v48 = vpop.permute.xlu1 %159  ;;  %1158 = vrot.lane.b32.xlu0 %v1579_v59, %s1371_s3  ;;  %v83_v47 = vld [vmem:[#allocation5] sm:$0xff] }
 0x250   :  { %v182_v51 = vmul.f32 %v160_v48, %v1448_v15  ;;  %v84_v48 = vld [vmem:[#allocation5 + $0x8] sm:$0xff] }
 0x251   :  { %376 = vmatpush.msra.mxu3 %v1140_v49 }
 0x252   :  { %v1147_v53 = vpack.i.bf16 %v181_v50, %v182_v51 }
 0x253   :  { %377 = vmatpush.msra.mxu3 %v1141_v52 }
 0x254   :  { %1148 = vrot.lane.b32.xlu2 %v1147_v53, %s1371_s3 }
 0x257   :  { %v1154_v32 = vpop.permute.xlu1 %1153 }
 0x2ae   :  { %v1149_v60 = vpop.permute.xlu2 %1148 }
 0x2af   :  { %v1150_v16 = vunpack.i.l.bf16 %v1149_v60  ;;  %v1151_v17 = vunpack.i.h.bf16 %v1149_v60 }
 0x2b9   :  { %v1144_v15 = vpop.permute.xlu0 %1143 }
 0x2ba   :  { %v1145_v19 = vunpack.i.l.bf16 %v1144_v15  ;;  %v1146_v61 = vunpack.i.h.bf16 %v1144_v15 }
 0x2bc   :  { %378 = vmatpush.msra.mxu3 %v1145_v19 }
 0x2be   :  { %v318_v62 = vpop.f32.mrf.mxu2  ;;  %379 = vmatpush.msra.mxu3 %v1146_v61  ;;  %v1648_v61 = vperm.slane %v1436_v9, 1 }
 0x2bf   :  { %1206 = vrcp.f32 %v318_v62 }
 0x2c0   :  { %380 = vmatpush.msra.mxu3 %v1150_v16 }
 0x2c2   :  { %381 = vmatpush.msra.mxu3 %v1151_v17 }
 0x2c4   :  { %562 = vmatpush.msrb.mxu3 %v96_v54 }
 0x2c5   :  { %v1207_v23 = vpop.eup %1206 }
 0x2c6   :  { %563 = vmatpush.msrb.mxu3 %v95_v55  ;;  %v321_v28 = vpop.f32.mrf.mxu2  ;;  %v326_v29 = vmul.f32 %v1207_v23, %v1203_v33  ;;  %v1156_v33 = vunpack.i.h.bf16 %v1154_v32 }
 0x2c7   :  { %1208 = vrcp.f32 %v321_v28 }
 0x2c8   :  { %564 = vmatpush.msrb.mxu3 %v94_v57 }
 0x2c9   :  { %1065 = vmatmul.msk.f32.vlgmr.msra.gmra.mxu3 %vm258_vm1, %v326_v29 }
 0x2ca   :  { %565 = vmatpush.msrb.mxu3 %v93_v58 }
 0x2cc   :  { %1093 = vmatpush.msra.mxu3 %v1510_v37  ;;  %v1155_v37 = vunpack.i.l.bf16 %v1154_v32 }
 0x2cd   :  { %v1209_v30 = vpop.eup %1208 }
 0x2ce   :  { %1094 = vmatpush.msra.mxu3 %v1508_v36  ;;  %v327_v31 = vmul.f32 %v1209_v30, %v1205_v38  ;;  %424 = vmatpush.msrb.mxu0 %v1155_v37  ;;  %v1159_v36 = vpop.permute.xlu0 %1158 }
 0x2cf   :  { %v1161_v34 = vunpack.i.h.bf16 %v1159_v36 }
 0x2d0   :  { %1095 = vmatpush.msra.mxu3 %v1539_v8  ;;  %425 = vmatpush.msrb.mxu0 %v1156_v33  ;;  %v1160_v8 = vunpack.i.l.bf16 %v1159_v36 }
 0x2d1   :  { %1066 = vmatmul.msk.f32.gmra.mxu3 %vm258_vm1, %v327_v31 }
 0x2d2   :  { %1096 = vmatpush.msra.mxu3 %v1537_v63  ;;  %426 = vmatpush.msrb.mxu0 %v1160_v8 }
 0x2d4   :  { %1097 = vmatpush.msra.mxu3 %v1541_v11  ;;  %427 = vmatpush.msrb.mxu0 %v1161_v34  ;;  %v1596_v11 = vperm.slane %v1436_v9, 2 }
 0x2d6   :  { %1098 = vmatpush.msra.mxu3 %v1545_v18 }
 0x2d8   :  { %1099 = vmatpush.msra.mxu3 %v1550_v24 }
 0x2d9   :  { %1071 = vmatmul.msk.f32.vlgmr.msrb.gmra.mxu3 %vm111_vm0, %v83_v47 }
 0x2da   :  { %1100 = vmatpush.msra.mxu3 %v1554_v25 }
 0x2e1   :  { %1072 = vmatmul.msk.f32.gmra.mxu3 %vm111_vm0, %v84_v48 }
 0x34c   :  { %v383_v35 = vpop.f32.mrf.mxu3 }
 0x34d   :  { %1067 = vmatmul.msk.f32.vlgmr.msrb.gmra.mxu0 %vm111_vm0, %v383_v35 }
 0x354   :  { %v386_v63 = vpop.f32.mrf.mxu3 }
 0x355   :  { %1068 = vmatmul.msk.f32.gmra.mxu0 %vm111_vm0, %v386_v63 }
 0x35c   :  { %v567_v19 = vpop.f32.mrf.mxu3 }
 0x35d   :  { %v1652_v16 = vadd.f32 %v567_v19, %v1648_v61 }
 0x35f   :  { %v611_v32 = vmul.f32 %v1652_v16, %v1462_v20  ;;  %v605_v19 = vmul.f32 %v1652_v16, %v1479_v27 }
 0x364   :  { %v570_v29 = vpop.f32.mrf.mxu3 }
 0x365   :  { %v1655_v31 = vadd.f32 %v570_v29, %v1648_v61 }
 0x367   :  { %v612_v36 = vmul.f32 %v1655_v31, %v1441_v12 }
 0x369   :  { %v1172_v35 = vpack.i.bf16 %v611_v32, %v612_v36 }
 0x3ca   :  { %v429_v18 = vpop.f32.mrf.mxu0 }
 0x3cb   :  { %v430_v24 = vadd.f32 %v429_v18, %v1596_v11 }
 0x3cd   :  { %v435_v25 = vadd.f32 %v430_v24, %v1427_v6  ;;  %v1373_v6 = vmov 32.0   ;;  %v609_v24 = vmul.f32 %v1652_v16, %v1464_v21 }
 0x3ce   :  { %1210 = vrcp.f32 %v1373_v6 }
 0x3cf   :  { %v437_v38 = vsel %vm111_vm0, %v435_v25, 0.0 }
 0x3d0   :  { %438 = vadd.xlane.f32.xlu2 %v437_v38 }
 0x3d2   :  { %v432_v39 = vpop.f32.mrf.mxu0 }
 0x3d3   :  { %v433_v40 = vadd.f32 %v432_v39, %v1596_v11 }
 0x3d5   :  { %v436_v41 = vadd.f32 %v433_v40, %v1432_v7  ;;  %v1211_v7 = vpop.eup %1210  ;;  %v610_v40 = vmul.f32 %v1655_v31, %v1443_v13 }
 0x3d6   :  { %v444_v43 = vmul.f32 32.0, %v1211_v7  ;;  %vm448_vm2 = vweird.f32 %v1211_v7 }
 0x3d7   :  { %v440_v42 = vsel %vm111_vm0, %v436_v41, 0.0 }
 0x3d8   :  { %441 = vadd.xlane.f32.xlu1 %v440_v42  ;;  %v445_v44 = vsub.f32 1.0, %v444_v43  ;;  %v1669_v42 = vperm.slane %v1436_v9, 3 }
 0x3da   :  { %v446_v45 = vmul.f32 %v1211_v7, %v445_v44  ;;  %v1673_v44 = vperm.slane %v1436_v9, 4 }
 0x3dc   :  { %v447_v46 = vadd.f32 %v1211_v7, %v446_v45 }
 0x3de   :  { %v1615_v0 = vsel %vm448_vm2, %v1211_v7, %v447_v46  ;;  %v1177_v46 = vpack.i.bf16 %v609_v24, %v610_v40 }
 0x3f1   :  { %1163 = vrot.lane.b32.xlu1 %v1162_v2, %s1372_s9 }
 0x3f9   :  { %583 = vrot.lane.b32.xlu1 %v1443_v13, %s1370_s2 }
 0x401   :  { %577 = vrot.lane.b32.xlu1 %v1466_v22, %s1370_s2 }
 0x409   :  { %511 = vrot.lane.b32.xlu1 %v1439_v10, %s1372_s9 }
 0x411   :  { %1173 = vrot.lane.b32.xlu1 %v1172_v35, %s1370_s2 }
 0x419   :  { %1178 = vrot.lane.b32.xlu1 %v1177_v46, %s1370_s2  ;;  %v88_v46 = vld [vmem:[#allocation7 + $0x18] sm:$0xff] }
 0x443   :  { %v439_v1 = vpop.xlane.xlu2 %438 }
 0x444   :  { %v450_v2 = vmul.f32 %v1615_v0, %v439_v1 }
 0x446   :  { %v1618_v49 = vsub.f32 %v435_v25, %v450_v2 }
 0x448   :  { %v454_v10 = vmul.f32 %v1618_v49, %v1618_v49 }
 0x44a   :  { %v456_v50 = vsel %vm111_vm0, %v454_v10, 0.0 }
 0x44b   :  { %457 = vadd.xlane.f32.xlu0 %v456_v50  ;;  %v442_v51 = vpop.xlane.xlu1 %441  ;;  %v607_v50 = vmul.f32 %v1652_v16, %v1466_v22 }
 0x44c   :  { %v451_v52 = vmul.f32 %v1615_v0, %v442_v51 }
 0x44e   :  { %v1625_v53 = vsub.f32 %v436_v41, %v451_v52 }
 0x450   :  { %v455_v54 = vmul.f32 %v1625_v53, %v1625_v53 }
 0x452   :  { %v459_v55 = vsel %vm111_vm0, %v455_v54, 0.0 }
 0x453   :  { %460 = vadd.xlane.f32.xlu2 %v459_v55 }
 0x45f   :  { %1168 = vrot.lane.b32.xlu0 %v1167_v5, %s1372_s9 }
 0x463   :  { %v1164_v3 = vpop.permute.xlu1 %1163 }
 0x464   :  { %v1165_v4 = vunpack.i.l.bf16 %v1164_v3  ;;  %v1166_v5 = vunpack.i.h.bf16 %v1164_v3 }
 0x466   :  { %532 = vmatpush.msrb.mxu2 %v1165_v4 }
 0x467   :  { %585 = vrot.lane.b32.xlu0 %v1462_v20, %s1370_s2 }
 0x468   :  { %533 = vmatpush.msrb.mxu2 %v1166_v5 }
 0x46b   :  { %587 = vrot.lane.b32.xlu2 %v1441_v12, %s1370_s2  ;;  %v584_v10 = vpop.permute.xlu1 %583 }
 0x46c   :  { %v602_v54 = vmul.f32 %v584_v10, %v1655_v31 }
 0x46f   :  { %579 = vrot.lane.b32.xlu0 %v1445_v14, %s1370_s2 }
 0x473   :  { %581 = vrot.lane.b32.xlu2 %v1464_v21, %s1370_s2 }
 0x477   :  { %573 = vrot.lane.b32.xlu0 %v1479_v27, %s1370_s2 }
 0x47b   :  { %575 = vrot.lane.b32.xlu2 %v1477_v26, %s1370_s2 }
 0x4be   :  { %v458_v57 = vpop.xlane.xlu0 %457 }
 0x4bf   :  { %v462_v58 = vmul.f32 %v458_v57, %v1615_v0 }
 0x4c1   :  { %v464_v15 = vadd.f32 1e-12, %v462_v58 }
 0x4c3   :  { %1212 = vrsqrt.f32 %v464_v15  ;;  %vm472_vm4 = vweird.f32 %v464_v15 }
 0x4c6   :  { %v461_v60 = vpop.xlane.xlu2 %460 }
 0x4c7   :  { %v463_v62 = vmul.f32 %v461_v60, %v1615_v0 }
 0x4c9   :  { %v1213_v17 = vpop.eup %1212  ;;  %v465_v23 = vadd.f32 1e-12, %v463_v62  ;;  %v578_v62 = vpop.permute.xlu1 %577 }
 0x4ca   :  { %v467_v28 = vmul.f32 %v1213_v17, %v464_v15  ;;  %vm473_vm3 = vweird.f32 %v1213_v17 }
 0x4cb   :  { %1214 = vrsqrt.f32 %v465_v23  ;;  %vm474_vm5 = vmor %vm472_vm4, %vm473_vm3  ;;  %vm482_vm7 = vweird.f32 %v465_v23 }
 0x4cc   :  { %v468_v30 = vmul.f32 %v1213_v17, %v467_v28 }
 0x4ce   :  { %v469_v37 = vmul.f32 0.5, %v468_v30  ;;  %v588_v33 = vpop.permute.xlu2 %587 }
 0x4cf   :  { %v604_v8 = vmul.f32 %v588_v33, %v1655_v31 }
 0x4d0   :  { %v470_v34 = vsub.f32 1.5, %v469_v37 }
 0x4d1   :  { %v1215_v63 = vpop.eup %1214  ;;  %v1169_v18 = vpop.permute.xlu0 %1168  ;;  %1073 = vmatpush.xpose.msk.msra.mxu0 %vm111_vm0, %v604_v8 }
 0x4d2   :  { %v471_v25 = vmul.f32 %v1213_v17, %v470_v34  ;;  %v477_v38 = vmul.f32 %v1215_v63, %v465_v23  ;;  %v1170_v39 = vunpack.i.l.bf16 %v1169_v18  ;;  %v1171_v41 = vunpack.i.h.bf16 %v1169_v18  ;;  %v512_v37 = vpop.permute.xlu1 %511 }
 0x4d3   :  { %vm483_vm6 = vweird.f32 %v1215_v63  ;;  %v599_v23 = vmul.f32 %v578_v62, %v1652_v16 }
 0x4d4   :  { %v475_v6 = vsel %vm474_vm5, %v1213_v17, %v471_v25  ;;  %v478_v7 = vmul.f32 %v1215_v63, %v477_v38  ;;  %534 = vmatpush.msrb.mxu2 %v1170_v39  ;;  %vm484_vm8 = vmor %vm482_vm7, %vm483_vm6  ;;  %vm1029_vm7 = vcmask 785408  }
 0x4d5   :  { %v486_v43 = vmul.f32 %v475_v6, %v1618_v49  ;;  %v608_v49 = vmul.f32 %v1655_v31, %v1445_v14 }
 0x4d6   :  { %v479_v45 = vmul.f32 0.5, %v478_v7  ;;  %535 = vmatpush.msrb.mxu2 %v1171_v41  ;;  %v582_v3 = vpop.permute.xlu2 %581  ;;  %v87_v7 = vld [vmem:[#allocation7 + $0x10] sm:$0xff] }
 0x4d7   :  { %v489_v47 = vmul.f32 %v1669_v42, %v486_v43  ;;  %v1182_v4 = vpack.i.bf16 %v607_v50, %v608_v49  ;;  %v601_v57 = vmul.f32 %v582_v3, %v1652_v16 }
 0x4d8   :  { %v480_v1 = vsub.f32 1.5, %v479_v45 }
 0x4d9   :  { %v1677_v2 = vadd.f32 %v1673_v44, %v489_v47  ;;  %v586_v48 = vpop.permute.xlu0 %585  ;;  %1183 = vrot.lane.b32.xlu1 %v1182_v4, %s1370_s2 }
 0x4da   :  { %v481_v51 = vmul.f32 %v1215_v63, %v480_v1  ;;  %v603_v9 = vmul.f32 %v586_v48, %v1652_v16  ;;  %v1174_v33 = vpop.permute.xlu1 %1173 }
 0x4db   :  { %1069 = vmatmul.msk.f32.vlgmr.msrb.gmra.mxu2 %vm111_vm0, %v1677_v2  ;;  %v1176_v36 = vunpack.i.h.bf16 %v1174_v33  ;;  %v1175_v8 = vunpack.i.l.bf16 %v1174_v33 }
 0x4dc   :  { %v485_v52 = vsel %vm484_vm8, %v1215_v63, %v481_v51  ;;  %1074 = vmatpush.xpose.msk.msra.mxu0 %vm111_vm0, %v603_v9 }
 0x4dd   :  { %v487_v55 = vmul.f32 %v485_v52, %v1625_v53  ;;  %v606_v53 = vmul.f32 %v1655_v31, %v1477_v26  ;;  %757 = vmatpush.msra.mxu2 %v1175_v8 }
 0x4de   :  { %v576_v28 = vpop.permute.xlu2 %575 }
 0x4df   :  { %v490_v5 = vmul.f32 %v1669_v42, %v487_v55  ;;  %v1187_v17 = vpack.i.bf16 %v605_v19, %v606_v53  ;;  %v598_v29 = vmul.f32 %v576_v28, %v1655_v31  ;;  %758 = vmatpush.msra.mxu2 %v1176_v36 }
 0x4e0   :  { %1075 = vmatpush.xpose.msk.msra.mxu0 %vm111_vm0, %v602_v54 }
 0x4e1   :  { %v1694_v58 = vadd.f32 %v1673_v44, %v490_v5  ;;  %v580_v15 = vpop.permute.xlu0 %579  ;;  %1188 = vrot.lane.b32.xlu1 %v1187_v17, %s1370_s2 }
 0x4e2   :  { %v600_v60 = vmul.f32 %v580_v15, %v1655_v31  ;;  %v1179_v34 = vpop.permute.xlu1 %1178 }
 0x4e3   :  { %1070 = vmatmul.msk.f32.gmra.mxu2 %vm111_vm0, %v1694_v58  ;;  %v1181_v35 = vunpack.i.h.bf16 %v1179_v34  ;;  %v1180_v63 = vunpack.i.l.bf16 %v1179_v34 }
 0x4e4   :  { %1076 = vmatpush.xpose.msk.msra.mxu0 %vm111_vm0, %v601_v57 }
 0x4e5   :  { %759 = vmatpush.msra.mxu2 %v1180_v63 }
 0x4e7   :  { %760 = vmatpush.msra.mxu2 %v1181_v35 }
 0x4e8   :  { %1077 = vmatpush.xpose.msk.msra.mxu0 %vm111_vm0, %v600_v60 }
 0x4e9   :  { %v574_v30 = vpop.permute.xlu0 %573  ;;  %1193 = vrot.lane.b32.xlu1 %v1575_v56, %s1372_s9 }
 0x4ea   :  { %v597_v32 = vmul.f32 %v574_v30, %v1652_v16 }
 0x4ec   :  { %1078 = vmatpush.xpose.msk.msra.mxu0 %vm111_vm0, %v599_v23 }
 0x4f0   :  { %1079 = vmatpush.xpose.msk.msra.mxu0 %vm111_vm0, %v598_v29 }
 0x4f4   :  { %1080 = vmatpush.xpose.msk.msra.mxu0 %vm111_vm0, %v597_v32 }
 0x54b   :  { %v1184_v18 = vpop.permute.xlu1 %1183 }
 0x54c   :  { %v1186_v31 = vunpack.i.h.bf16 %v1184_v18  ;;  %v1185_v24 = vunpack.i.l.bf16 %v1184_v18  ;;  %v100_v18 = vld [vmem:[#allocation8 + $0x58] sm:$0xff] }
 0x54d   :  { %897 = vmatpush.msra.mxu1 %v100_v18 }
 0x54e   :  { %761 = vmatpush.msra.mxu2 %v1185_v24 }
 0x550   :  { %762 = vmatpush.msra.mxu2 %v1186_v31  ;;  %v99_v31 = vld [vmem:[#allocation8 + $0x50] sm:$0xff] }
 0x551   :  { %898 = vmatpush.msra.mxu1 %v99_v31 }
 0x553   :  { %v1189_v38 = vpop.permute.xlu1 %1188 }
 0x554   :  { %v1191_v39 = vunpack.i.h.bf16 %v1189_v38  ;;  %v1190_v40 = vunpack.i.l.bf16 %v1189_v38  ;;  %v97_v38 = vld [vmem:[#allocation8 + $0x40] sm:$0xff] }
 0x556   :  { %763 = vmatpush.msra.mxu2 %v1190_v40 }
 0x558   :  { %764 = vmatpush.msra.mxu2 %v1191_v39 }
 0x55a   :  { %943 = vmatpush.msrb.mxu2 %v1441_v12 }
 0x55b   :  { %v1194_v55 = vpop.permute.xlu1 %1193 }
 0x55c   :  { %944 = vmatpush.msrb.mxu2 %v1462_v20  ;;  %v1196_v4 = vunpack.i.h.bf16 %v1194_v55  ;;  %v1195_v5 = vunpack.i.l.bf16 %v1194_v55 }
 0x55e   :  { %v537_v25 = vpop.f32.mrf.mxu2  ;;  %945 = vmatpush.msrb.mxu2 %v1443_v13  ;;  %806 = vmatpush.msrb.mxu3 %v1195_v5 }
 0x55f   :  { %v538_v16 = vadd.f32 %v537_v25, %v512_v37 }
 0x560   :  { %946 = vmatpush.msrb.mxu2 %v1464_v21  ;;  %807 = vmatpush.msrb.mxu3 %v1196_v4 }
 0x561   :  { %1081 = vmatmul.msk.f32.vlgmr.msra.gmra.mxu0 %vm111_vm0, %v538_v16  ;;  %v98_v16 = vld [vmem:[#allocation8 + $0x48] sm:$0xff] }
 0x562   :  { %947 = vmatpush.msrb.mxu2 %v1445_v14  ;;  %899 = vmatpush.msra.mxu1 %v98_v16 }
 0x564   :  { %948 = vmatpush.msrb.mxu2 %v1466_v22  ;;  %900 = vmatpush.msra.mxu1 %v97_v38 }
 0x566   :  { %v540_v41 = vpop.f32.mrf.mxu2  ;;  %949 = vmatpush.msrb.mxu2 %v1477_v26 }
 0x567   :  { %v541_v6 = vadd.f32 %v540_v41, %v512_v37 }
 0x568   :  { %950 = vmatpush.msrb.mxu2 %v1479_v27 }
 0x569   :  { %1082 = vmatmul.msk.f32.gmra.mxu0 %vm111_vm0, %v541_v6 }
 0x5de   :  { %v660_v43 = vpop.f32.mrf.mxu0 }
 0x5df   :  { %v661_v45 = vadd.f32 %v660_v43, %v87_v7 }
 0x5e1   :  { %v666_v12 = vsel %vm258_vm1, %v661_v45, -inf }
 0x5e2   :  { %667 = vmax.xlane.f32.xlu2 %v666_v12 }
 0x5e6   :  { %v663_v20 = vpop.f32.mrf.mxu0 }
 0x5e7   :  { %v664_v47 = vadd.f32 %v663_v20, %v88_v46 }
 0x5e9   :  { %v669_v13 = vsel %vm258_vm1, %v664_v47, -inf }
 0x5ea   :  { %670 = vmax.xlane.f32.xlu0 %v669_v13 }
 0x5fa   :  { %1198 = vrot.lane.b32.xlu2 %v1579_v59, %s1372_s9 }
 0x5fe   :  { %785 = vrot.lane.b32.xlu0 %v1596_v11, %s1370_s2 }
 0x655   :  { %v668_v14 = vpop.xlane.xlu2 %667 }
 0x656   :  { %v672_v21 = vsub.f32 %v661_v45, %v668_v14 }
 0x658   :  { %v674_v22 = vmul.f32 1.442695, %v672_v21 }
 0x65a   :  { %1216 = vpow2.f32 %v674_v22 }
 0x65d   :  { %v671_v26 = vpop.xlane.xlu0 %670  ;;  %v1199_v3 = vpop.permute.xlu2 %1198 }
 0x65e   :  { %v673_v27 = vsub.f32 %v664_v47, %v671_v26  ;;  %v1200_v56 = vunpack.i.l.bf16 %v1199_v3  ;;  %v1201_v57 = vunpack.i.h.bf16 %v1199_v3 }
 0x660   :  { %v1217_v1 = vpop.eup %1216  ;;  %v676_v48 = vmul.f32 1.442695, %v673_v27  ;;  %808 = vmatpush.msrb.mxu3 %v1200_v56 }
 0x661   :  { %1083 = vmatmul.msk.f32.vlgmr.msrb.gmra.mxu1 %vm258_vm1, %v1217_v1 }
 0x662   :  { %1218 = vpow2.f32 %v676_v48  ;;  %809 = vmatpush.msrb.mxu3 %v1201_v57 }
 0x668   :  { %v1219_v10 = vpop.eup %1218 }
 0x669   :  { %1084 = vmatmul.msk.f32.vlgmr.msra.gmra.mxu3 %vm258_vm1, %v1219_v10 }
 0x670   :  { %v786_v19 = vpop.permute.xlu0 %785 }
 0x6de   :  { %v701_v50 = vpop.f32.mrf.mxu1 }
 0x6df   :  { %1220 = vrcp.f32 %v701_v50 }
 0x6e5   :  { %v1221_v51 = vpop.eup %1220 }
 0x6e6   :  { %v709_v9 = vmul.f32 %v1221_v51, %v1217_v1 }
 0x6e8   :  { %1085 = vmatmul.msk.f32.vlgmr.msra.gmra.mxu2 %vm258_vm1, %v709_v9 }
 0x6ec   :  { %v704_v49 = vpop.f32.mrf.mxu3 }
 0x6ed   :  { %1222 = vrcp.f32 %v704_v49 }
 0x6f3   :  { %v1223_v52 = vpop.eup %1222 }
 0x6f4   :  { %v710_v54 = vmul.f32 %v1223_v52, %v1219_v10 }
 0x6f6   :  { %1086 = vmatmul.msk.f32.gmra.mxu2 %vm258_vm1, %v710_v54 }
 0x76b   :  { %v766_v59 = vpop.f32.mrf.mxu2 }
 0x76c   :  { %1087 = vmatmul.msk.f32.vlgmr.msrb.gmra.mxu3 %vm111_vm0, %v766_v59 }
 0x779   :  { %v769_v15 = vpop.f32.mrf.mxu2 }
 0x77a   :  { %1088 = vmatmul.msk.f32.gmra.mxu3 %vm111_vm0, %v769_v15 }
 0x7ef   :  { %v811_v53 = vpop.f32.mrf.mxu3 }
 0x7f0   :  { %v812_v60 = vadd.f32 %v811_v53, %v786_v19 }
 0x7f2   :  { %v817_v62 = vadd.f32 %v812_v60, %v1677_v2 }
 0x7f4   :  { %v819_v17 = vsel %vm111_vm0, %v817_v62, 0.0 }
 0x7f5   :  { %820 = vadd.xlane.f32.xlu1 %v819_v17 }
 0x7fd   :  { %v814_v23 = vpop.f32.mrf.mxu3 }
 0x7fe   :  { %v815_v28 = vadd.f32 %v814_v23, %v786_v19 }
 0x800   :  { %v818_v29 = vadd.f32 %v815_v28, %v1694_v58 }
 0x802   :  { %v822_v30 = vsel %vm111_vm0, %v818_v29, 0.0 }
 0x803   :  { %823 = vadd.xlane.f32.xlu0 %v822_v30 }
 0x817   :  { %876 = vrot.lane.b32.xlu0 %v1648_v61, %s1371_s3 }
 0x868   :  { %v821_v32 = vpop.xlane.xlu1 %820 }
 0x869   :  { %v825_v37 = vmul.f32 %v821_v32, %v1615_v0 }
 0x86b   :  { %v827_v33 = vsub.f32 %v817_v62, %v825_v37 }
 0x86d   :  { %v829_v36 = vmul.f32 %v827_v33, %v827_v33 }
 0x86f   :  { %v831_v2 = vsel %vm111_vm0, %v829_v36, 0.0 }
 0x870   :  { %832 = vadd.xlane.f32.xlu2 %v831_v2 }
 0x876   :  { %v824_v8 = vpop.xlane.xlu0 %823 }
 0x877   :  { %v826_v34 = vmul.f32 %v824_v8, %v1615_v0 }
 0x879   :  { %v828_v35 = vsub.f32 %v818_v29, %v826_v34 }
 0x87b   :  { %v830_v63 = vmul.f32 %v828_v35, %v828_v35 }
 0x87d   :  { %v834_v58 = vsel %vm111_vm0, %v830_v63, 0.0 }
 0x87e   :  { %835 = vadd.xlane.f32.xlu1 %v834_v58 }
 0x888   :  { %870 = vrot.lane.b32.xlu2 %v1673_v44, %s1370_s2 }
 0x889   :  { %v877_v52 = vpop.permute.xlu0 %876 }
 0x897   :  { %864 = vrot.lane.b32.xlu1 %v1669_v42, %s1370_s2 }
 0x89f   :  { %926 = vrot.lane.b32.xlu1 %v1596_v11, %s1371_s3 }
 0x8e3   :  { %v833_v61 = vpop.xlane.xlu2 %832 }
 0x8e4   :  { %v837_v24 = vmul.f32 %v833_v61, %v1615_v0 }
 0x8e6   :  { %v839_v25 = vadd.f32 1e-12, %v837_v24 }
 0x8e8   :  { %1224 = vrsqrt.f32 %v839_v25  ;;  %vm847_vm10 = vweird.f32 %v839_v25 }
 0x8eb   :  { %v871_v48 = vpop.permute.xlu2 %870 }
 0x8ee   :  { %v1225_v39 = vpop.eup %1224 }
 0x8ef   :  { %v842_v40 = vmul.f32 %v1225_v39, %v839_v25  ;;  %vm848_vm9 = vweird.f32 %v1225_v39 }
 0x8f0   :  { %vm849_vm11 = vmor %vm847_vm10, %vm848_vm9 }
 0x8f1   :  { %v836_v41 = vpop.xlane.xlu1 %835  ;;  %v843_v11 = vmul.f32 %v1225_v39, %v842_v40 }
 0x8f2   :  { %v838_v6 = vmul.f32 %v836_v41, %v1615_v0 }
 0x8f3   :  { %v844_v43 = vmul.f32 0.5, %v843_v11 }
 0x8f4   :  { %v840_v7 = vadd.f32 1e-12, %v838_v6 }
 0x8f5   :  { %v845_v12 = vsub.f32 1.5, %v844_v43 }
 0x8f6   :  { %1226 = vrsqrt.f32 %v840_v7  ;;  %vm857_vm13 = vweird.f32 %v840_v7 }
 0x8f7   :  { %v846_v13 = vmul.f32 %v1225_v39, %v845_v12 }
 0x8f9   :  { %v850_v21 = vsel %vm849_vm11, %v1225_v39, %v846_v13 }
 0x8fa   :  { %v861_v26 = vmul.f32 %v850_v21, %v827_v33 }
 0x8fc   :  { %v1227_v45 = vpop.eup %1226 }
 0x8fd   :  { %v852_v46 = vmul.f32 %v1227_v45, %v840_v7  ;;  %vm858_vm12 = vweird.f32 %v1227_v45 }
 0x8fe   :  { %vm859_vm14 = vmor %vm857_vm13, %vm858_vm12 }
 0x8ff   :  { %v853_v20 = vmul.f32 %v1227_v45, %v852_v46 }
 0x901   :  { %v854_v47 = vmul.f32 0.5, %v853_v20 }
 0x903   :  { %v855_v14 = vsub.f32 1.5, %v854_v47 }
 0x905   :  { %v856_v22 = vmul.f32 %v1227_v45, %v855_v14 }
 0x907   :  { %v860_v27 = vsel %vm859_vm14, %v1227_v45, %v856_v22 }
 0x908   :  { %v862_v50 = vmul.f32 %v860_v27, %v828_v35 }
 0x909   :  { %v865_v1 = vpop.permute.xlu1 %864 }
 0x90a   :  { %v867_v10 = vmul.f32 %v865_v1, %v861_v26  ;;  %v868_v9 = vmul.f32 %v865_v1, %v862_v50 }
 0x90c   :  { %v873_v51 = vadd.f32 %v871_v48, %v867_v10  ;;  %v874_v49 = vadd.f32 %v871_v48, %v868_v9 }
 0x90e   :  { %1089 = vmatmul.msk.f32.vlgmr.msra.gmra.mxu1 %vm111_vm0, %v873_v51 }
 0x911   :  { %v927_v2 = vpop.permute.xlu1 %926 }
 0x916   :  { %1090 = vmatmul.msk.f32.gmra.mxu1 %vm111_vm0, %v874_v49 }
 0x98b   :  { %v902_v54 = vpop.f32.mrf.mxu1 }
 0x98c   :  { %v903_v55 = vadd.f32 %v902_v54, %v877_v52 }
 0x98e   :  { %v910_v3 = vmul.f32 0.044715, %v903_v55  ;;  %v908_v28 = vmul.f32 0.5, %v903_v55 }
 0x990   :  { %v912_v4 = vmul.f32 %v910_v3, %v903_v55 }
 0x992   :  { %v914_v5 = vmul.f32 %v912_v4, %v903_v55 }
 0x993   :  { %v905_v56 = vpop.f32.mrf.mxu1 }
 0x994   :  { %v916_v57 = vadd.f32 %v914_v5, %v903_v55  ;;  %v906_v59 = vadd.f32 %v905_v56, %v877_v52 }
 0x996   :  { %v918_v15 = vmul.f32 0.7978846, %v916_v57  ;;  %v911_v19 = vmul.f32 0.044715, %v906_v59  ;;  %v909_v37 = vmul.f32 0.5, %v906_v59 }
 0x998   :  { %1228 = vtanh.f32 %v918_v15  ;;  %v913_v53 = vmul.f32 %v911_v19, %v906_v59 }
 0x99a   :  { %v915_v60 = vmul.f32 %v913_v53, %v906_v59 }
 0x99c   :  { %v917_v62 = vadd.f32 %v915_v60, %v906_v59 }
 0x99e   :  { %v1229_v17 = vpop.eup %1228  ;;  %v919_v23 = vmul.f32 0.7978846, %v917_v62 }
 0x99f   :  { %v922_v29 = vadd.f32 1.0, %v1229_v17 }
 0x9a0   :  { %1230 = vtanh.f32 %v919_v23 }
 0x9a1   :  { %v924_v30 = vmul.f32 %v922_v29, %v908_v28 }
 0x9a3   :  { %1091 = vmatmul.msk.f32.vlgmr.msrb.gmra.mxu2 %vm258_vm1, %v924_v30 }
 0x9a6   :  { %v1231_v32 = vpop.eup %1230 }
 0x9a7   :  { %v923_v33 = vadd.f32 1.0, %v1231_v32 }
 0x9a9   :  { %v925_v36 = vmul.f32 %v923_v33, %v909_v37 }
 0x9ab   :  { %1092 = vmatmul.msk.f32.gmra.mxu2 %vm258_vm1, %v925_v36 }
 0xa26   :  { %v952_v8 = vpop.f32.mrf.mxu2 }
 0xa27   :  { %v953_v34 = vadd.f32 %v952_v8, %v927_v2 }
 0xa29   :  { %v958_v35 = vadd.f32 %v953_v34, %v873_v51 }
 0xa2b   :  { %v960_v63 = vsel %vm111_vm0, %v958_v35, 0.0 }
 0xa2c   :  { %961 = vadd.xlane.f32.xlu0 %v960_v63 }
 0xa2e   :  { %v955_v58 = vpop.f32.mrf.mxu2 }
 0xa2f   :  { %v956_v61 = vadd.f32 %v955_v58, %v927_v2 }
 0xa31   :  { %v959_v18 = vadd.f32 %v956_v61, %v874_v49 }
 0xa33   :  { %v963_v31 = vsel %vm111_vm0, %v959_v18, 0.0 }
 0xa34   :  { %964 = vadd.xlane.f32.xlu1 %v963_v31 }
 0xa4d   :  { %1004 = vrot.lane.b32.xlu1 %v1669_v42, %s1371_s3 }
 0xa9f   :  { %v962_v24 = vpop.xlane.xlu0 %961 }
 0xaa0   :  { %v966_v25 = vmul.f32 %v962_v24, %v1615_v0 }
 0xaa2   :  { %v968_v16 = vsub.f32 %v958_v35, %v966_v25 }
 0xaa4   :  { %v970_v38 = vmul.f32 %v968_v16, %v968_v16 }
 0xaa6   :  { %v972_v39 = vsel %vm111_vm0, %v970_v38, 0.0 }
 0xaa7   :  { %v965_v40 = vpop.xlane.xlu1 %964  ;;  %973 = vadd.xlane.f32.xlu2 %v972_v39 }
 0xaa8   :  { %v967_v41 = vmul.f32 %v965_v40, %v1615_v0 }
 0xaaa   :  { %v969_v6 = vsub.f32 %v959_v18, %v967_v41 }
 0xaac   :  { %v971_v7 = vmul.f32 %v969_v6, %v969_v6 }
 0xaae   :  { %v975_v11 = vsel %vm111_vm0, %v971_v7, 0.0 }
 0xaaf   :  { %976 = vadd.xlane.f32.xlu0 %v975_v11 }
 0xabf   :  { %1009 = vrot.lane.b32.xlu2 %v1673_v44, %s1371_s3  ;;  %v1005_v48 = vpop.permute.xlu1 %1004 }
 0xb1a   :  { %v974_v42 = vpop.xlane.xlu2 %973 }
 0xb1b   :  { %v978_v43 = vmul.f32 %v974_v42, %v1615_v0 }
 0xb1d   :  { %v980_v45 = vadd.f32 1e-12, %v978_v43 }
 0xb1f   :  { %1232 = vrsqrt.f32 %v980_v45  ;;  %vm988_vm2 = vweird.f32 %v980_v45 }
 0xb22   :  { %v977_v12 = vpop.xlane.xlu0 %976  ;;  %v1010_v9 = vpop.permute.xlu2 %1009 }
 0xb23   :  { %v979_v46 = vmul.f32 %v977_v12, %v1615_v0 }
 0xb25   :  { %v1233_v20 = vpop.eup %1232  ;;  %v981_v47 = vadd.f32 1e-12, %v979_v46 }
 0xb26   :  { %v983_v13 = vmul.f32 %v1233_v20, %v980_v45  ;;  %vm989_vm15 = vweird.f32 %v1233_v20 }
 0xb27   :  { %1234 = vrsqrt.f32 %v981_v47  ;;  %vm990_vm3 = vmor %vm988_vm2, %vm989_vm15  ;;  %vm998_vm5 = vweird.f32 %v981_v47 }
 0xb28   :  { %v984_v14 = vmul.f32 %v1233_v20, %v983_v13 }
 0xb2a   :  { %v985_v21 = vmul.f32 0.5, %v984_v14 }
 0xb2c   :  { %v986_v22 = vsub.f32 1.5, %v985_v21 }
 0xb2d   :  { %v1235_v26 = vpop.eup %1234 }
 0xb2e   :  { %v993_v27 = vmul.f32 %v1235_v26, %v981_v47  ;;  %v987_v44 = vmul.f32 %v1233_v20, %v986_v22  ;;  %vm999_vm4 = vweird.f32 %v1235_v26 }
 0xb2f   :  { %vm1000_vm6 = vmor %vm998_vm5, %vm999_vm4 }
 0xb30   :  { %v994_v1 = vmul.f32 %v1235_v26, %v993_v27  ;;  %v991_v10 = vsel %vm990_vm3, %v1233_v20, %v987_v44 }
 0xb31   :  { %v1002_v50 = vmul.f32 %v991_v10, %v968_v16 }
 0xb32   :  { %v995_v51 = vmul.f32 0.5, %v994_v1 }
 0xb33   :  { %v1007_v0 = vmul.f32 %v1005_v48, %v1002_v50 }
 0xb34   :  { %v996_v49 = vsub.f32 1.5, %v995_v51 }
 0xb35   :  { %v1012_v52 = vadd.f32 %v1010_v9, %v1007_v0 }
 0xb36   :  { %v997_v54 = vmul.f32 %v1235_v26, %v996_v49 }
 0xb37   :  { %v1015_v55 = vrot.slane %v1012_v52, 4 }
 0xb38   :  { %v1001_v3 = vsel %vm1000_vm6, %v1235_v26, %v997_v54 }
 0xb39   :  { %v1003_v4 = vmul.f32 %v1001_v3, %v969_v6  ;;  %1016 = vrot.lane.b32.xlu0 %v1015_v55, %s1372_s9 }
 0xb3b   :  { %v1008_v5 = vmul.f32 %v1005_v48, %v1003_v4 }
 0xb3d   :  { %v1013_v56 = vadd.f32 %v1010_v9, %v1008_v5 }
 0xb3f   :  { %v1023_v57 = vrot.slane %v1013_v56, 4  ;;  %1020 = vrot.lane.b32.xlu1 %v1013_v56, %s1371_s3 }
 0xb41   :  { %1024 = vrot.lane.b32.xlu2 %v1023_v57, %s1370_s2 }
 0xb9b   :  { %v1025_v53 = vpop.permute.xlu2 %1024 }
 0xbab   :  { %v1017_v59 = vpop.permute.xlu0 %1016 }
 0xbac   :  { %v1027_v15 = vsel %vm111_vm0, %v1012_v52, %v1017_v59 }
 0xbb1   :  { %v1021_v19 = vpop.permute.xlu1 %1020 }
 0xbb2   :  { %v1028_v60 = vsel %vm258_vm1, %v1027_v15, %v1021_v19 }
 0xbb3   :  { %v1030_v62 = vsel %vm1029_vm7, %v1028_v60, %v1025_v53 }
 0xbb4   :  { %1031 = vst [vmem:[#allocation10] sm:$0xf] %v1030_v62 }
 0xbb5   :  { %1042 = dma.vmem_to_hbm [thread:$0]  %s1038_s11, 64, %s1040_s14, [#allocation4]  }
 0xbb6   :  { %1362 = dma.done.wait [#allocation4], 64  }
 0xbb7   :  { %1363 = vsyncadd [#allocation4], 4294967232 }
 0xbb8   :  { %1047 = vsyncpa [#allocation3], 1 }
 0xbb9   :  { %1048 = vsyncpa [#allocation6], 1 }
 0xbba   :  { %1049 = vsyncpa [#allocation9], 1 }
 0xbbb   :  { %1050 = vsyncpa [#allocation4], 1 }

</bundles_post_ra>
